<compile_context>
chip_gen: v7x
topology: tpu7x:2x2x1
jax: 0.10.0
libtpu: 0.0.40
codegen_flags: <defaults>
</compile_context>

<pallas_src>
import jax
import jax.numpy as jnp
from jax.experimental import pallas as pl
from jax.experimental.pallas import tpu as pltpu

HIDDEN_DIM = 32     # utils.HIDDEN_DIM
LSTM_LAYERS = 2     # utils.LSTM_LAYERS


# ----------------------------- fused Pallas kernel ------------------------------

def make_fused_kernel(T, B, H, L, layer_meta, off_fcw, off_fcb, has_state):
    """Fused kernel: L wavefronted LSTM layers + online abs-max pooling + FC + log_softmax.

    layer_meta[l] = (row_off_wih, din_l, row_off_whh, row_off_bias) into the packed weights.
    Gate column order inside the packed weights is [i, f, o, g] (sigmoid on lanes < 3H).
    """
    G = 4 * H

    def kernel(*refs):
        if has_state:
            x_ref, len_ref, w_ref, h0_ref, c0_ref, logp_ref, state_ref = refs
        else:
            x_ref, len_ref, w_ref, logp_ref, state_ref = refs

        lens = len_ref[...]                                        # (B, 1) int32, loaded once
        lane = jax.lax.broadcasted_iota(jnp.int32, (B, G), 1)
        sig_mask = lane < 3 * H                                    # [i|f|o] sigmoid, [g] tanh

        # Loop-invariant weight views (static row slices into the single packed array).
        wih, whh, bias = [], [], []
        for (o_wih, din, o_whh, o_b) in layer_meta:
            wih.append(w_ref[o_wih:o_wih + din, :])                # (din_l, 4H)
            whh.append(w_ref[o_whh:o_whh + H, :])                  # (H, 4H)
            bias.append(w_ref[o_b:o_b + 1, :])                     # (1, 4H)
        fcw = w_ref[off_fcw:off_fcw + H, :]                        # (H, 4H) zero-padded cols
        fcb = w_ref[off_fcb:off_fcb + 1, :]                        # (1, 4H) pad lanes = -1e30

        if has_state:
            h = [h0_ref[l] for l in range(L)]
            c = [c0_ref[l] for l in range(L)]
        else:
            h = [jnp.zeros((B, H), jnp.float32) for _ in range(L)]
            c = [jnp.zeros((B, H), jnp.float32) for _ in range(L)]

        # Layer-0 input projection hoisted over the whole sequence (input is not recurrent).
        gx0 = jnp.dot(x_ref[...], wih[0], preferred_element_type=jnp.float32) + bias[0]

        best_val = None
        best_abs = None
        for t in range(T):                                         # small static T -> unrolled
            m = lens > t                                           # (B, 1) bool, per-step VPU cmp
            inp = None
            for l in range(L):                                     # wavefront: layer l uses y_t
                if l == 0:
                    gates = gx0[t * B:(t + 1) * B, :] + jnp.dot(
                        h[0], whh[0], preferred_element_type=jnp.float32)
                else:
                    gates = (bias[l]
                             + jnp.dot(inp, wih[l], preferred_element_type=jnp.float32)
                             + jnp.dot(h[l], whh[l], preferred_element_type=jnp.float32))

                # Two full-vreg EUP passes + static lane-mask blend ([i,f,o,g] packing).
                act = jnp.where(sig_mask, jax.nn.sigmoid(gates), jnp.tanh(gates))
                i_g = act[:, 0:H]
                f_g = act[:, H:2 * H]
                o_g = act[:, 2 * H:3 * H]
                g_g = act[:, 3 * H:4 * H]

                c_new = f_g * c[l] + i_g * g_g
                h_new = o_g * jnp.tanh(c_new)

                h[l] = jnp.where(m, h_new, h[l])
                c[l] = jnp.where(m, c_new, c[l])
                inp = jnp.where(m, h_new, jnp.zeros_like(h_new))   # padded positions -> 0

            # Online abs-max pooling on last layer's y_t (strict '>' keeps earliest index on
            # ties, matching torch.max's first-occurrence argmax).
            a = jnp.abs(inp)
            if t == 0:
                best_val, best_abs = inp, a
            else:
                take = a > best_abs
                best_val = jnp.where(take, inp, best_val)
                best_abs = jnp.where(take, a, best_abs)

        # FC + stable log_softmax epilogue over lane-padded logits (pad lanes are -1e30 and
        # contribute exp(...)=0 to the denominator).
        logits = jnp.dot(best_val, fcw, preferred_element_type=jnp.float32) + fcb  # (B, 4H)
        mx = jnp.max(logits, axis=1, keepdims=True)
        s = logits - mx
        lse = jnp.log(jnp.sum(jnp.exp(s), axis=1, keepdims=True))

        logp_ref[...] = s - lse                                    # (B, 4H) lane-dense
        state_ref[...] = jnp.concatenate(h + c, axis=1)            # (B, 2*L*H) lane-dense

    return kernel


# ------------------------------- packing helpers -----------------------------

def _reorder_gate_cols(w, H):
    """PyTorch gate column order [i,f,g,o] -> kernel order [i,f,o,g]."""
    return jnp.concatenate([w[..., :2 * H], w[..., 3 * H:4 * H], w[..., 2 * H:3 * H]], axis=-1)


def _pack_params(layer_params, fc_w_t, fc_b, H, C):
    """Row-concatenate all weights into one (rows, 4H) array with 8-aligned section offsets."""
    G = 4 * H
    blocks, meta = [], []
    cur = 0

    def pad_rows(a):
        r = a.shape[0]
        rp = ((r + 7) // 8) * 8
        if rp != r:
            a = jnp.concatenate([a, jnp.zeros((rp - r, a.shape[1]), a.dtype)], axis=0)
        return a

    for (wih, whh, b) in layer_params:
        din = wih.shape[0]
        wih_r = pad_rows(_reorder_gate_cols(wih, H))
        whh_r = pad_rows(_reorder_gate_cols(whh, H))
        b_row = jnp.zeros((8, G), jnp.float32).at[0].set(
            _reorder_gate_cols(b.reshape(1, G), H)[0])
        o_wih = cur
        o_whh = cur + wih_r.shape[0]
        o_b = o_whh + whh_r.shape[0]
        meta.append((o_wih, din, o_whh, o_b))
        blocks += [wih_r, whh_r, b_row]
        cur = o_b + 8

    fcw_pad = pad_rows(jnp.zeros((H, G), jnp.float32).at[:, :C].set(fc_w_t))
    off_fcw = cur
    cur += fcw_pad.shape[0]
    fcb_row = jnp.full((8, G), -1e30, jnp.float32).at[0, :C].set(fc_b)
    off_fcb = cur
    cur += 8
    blocks += [fcw_pad, fcb_row]

    return jnp.concatenate(blocks, axis=0), meta, off_fcw, off_fcb


# ------------------------------- wrapper -----------------------------------

def lstm_model_forward(x, x_seq_lengths, layer_params, fc_w_t, fc_b,
                       hidden=None, cell=None):
    """Equivalent of LSTM.forward((x, x_seq_lengths), hidden, cell)."""
    B, T, D = x.shape
    H = layer_params[0][1].shape[0]
    L = len(layer_params)
    C = fc_w_t.shape[1]
    G = 4 * H
    B_pad = max(8, ((B + 7) // 8) * 8)                 # 8-sublane-aligned batch

    # Pad batch (padded lengths = 0 -> those rows stay at the zero init and pool to 0).
    x_p = jnp.zeros((B_pad, T, D), jnp.float32).at[:B].set(x)
    lens_p = jnp.zeros((B_pad, 1), jnp.int32).at[:B, 0].set(x_seq_lengths.astype(jnp.int32))
    # Time-major rows so each per-step gx slice is an 8-sublane-aligned block.
    x_flat = jnp.transpose(x_p, (1, 0, 2)).reshape(T * B_pad, D)

    W, layer_meta, off_fcw, off_fcb = _pack_params(layer_params, fc_w_t, fc_b, H, C)

    has_state = hidden is not None and cell is not None
    inputs = [x_flat, lens_p, W]
    if has_state:
        h0 = jnp.zeros((L, B_pad, H), jnp.float32).at[:, :B].set(hidden)
        c0 = jnp.zeros((L, B_pad, H), jnp.float32).at[:, :B].set(cell)
        inputs += [h0, c0]

    vmem = lambda: pl.BlockSpec(memory_space=pltpu.MemorySpace.VMEM)

    logp_pad, state = pl.pallas_call(
        make_fused_kernel(T, B_pad, H, L, layer_meta, off_fcw, off_fcb, has_state),
        out_shape=(jax.ShapeDtypeStruct((B_pad, G), jnp.float32),
                   jax.ShapeDtypeStruct((B_pad, 2 * L * H), jnp.float32)),
        in_specs=[vmem() for _ in inputs],
        out_specs=(vmem(), vmem()),
    )(*inputs)

    log_probs = logp_pad[:B, :C]
    hT = jnp.stack([state[:B, l * H:(l + 1) * H] for l in range(L)], axis=0)
    cT = jnp.stack([state[:B, (L + l) * H:(L + l + 1) * H] for l in range(L)], axis=0)
    return log_probs, (hT, cT)


# --------------------------- parameter init ---------------------------------

def init_params(key, embedding_dim, no_classes, hidden_size, lstm_layers):
    """PyTorch-style uniform(-1/sqrt(H), 1/sqrt(H)) init, deterministic. Gate order [i,f,g,o]."""
    bound = 1.0 / float(hidden_size) ** 0.5
    keys = jax.random.split(key, lstm_layers * 4 + 2)
    layer_params = []
    ki = 0
    for l in range(lstm_layers):
        din = embedding_dim if l == 0 else hidden_size
        w_ih = jax.random.uniform(keys[ki], (4 * hidden_size, din), jnp.float32, -bound, bound); ki += 1
        w_hh = jax.random.uniform(keys[ki], (4 * hidden_size, hidden_size), jnp.float32, -bound, bound); ki += 1
        b_ih = jax.random.uniform(keys[ki], (4 * hidden_size,), jnp.float32, -bound, bound); ki += 1
        b_hh = jax.random.uniform(keys[ki], (4 * hidden_size,), jnp.float32, -bound, bound); ki += 1
        layer_params.append((w_ih.T, w_hh.T, (b_ih + b_hh).reshape(1, 4 * hidden_size)))
    fcb = 1.0 / float(hidden_size) ** 0.5
    fc_w = jax.random.uniform(keys[ki], (no_classes, hidden_size), jnp.float32, -fcb, fcb); ki += 1
    fc_b = jax.random.uniform(keys[ki], (no_classes,), jnp.float32, -fcb, fcb)
    return layer_params, fc_w.T, fc_b


# ------------------------------ pure-JAX ref ---------------------------------

def reference_forward(x, lengths, layer_params, fc_w_t, fc_b):
    B, T, _ = x.shape
    cur = x
    hs, cs = [], []
    for (wih, whh, b) in layer_params:
        H = whh.shape[0]
        h = jnp.zeros((B, H), jnp.float32)
        c = jnp.zeros((B, H), jnp.float32)
        ys = []
        for t in range(T):
            gates = cur[:, t, :] @ wih + h @ whh + b
            i_g = jax.nn.sigmoid(gates[:, :H])
            f_g = jax.nn.sigmoid(gates[:, H:2 * H])
            g_g = jnp.tanh(gates[:, 2 * H:3 * H])
            o_g = jax.nn.sigmoid(gates[:, 3 * H:])
            c_new = f_g * c + i_g * g_g
            h_new = o_g * jnp.tanh(c_new)
            m = (lengths > t)[:, None]
            h = jnp.where(m, h_new, h)
            c = jnp.where(m, c_new, c)
            ys.append(jnp.where(m, h_new, 0.0))
        cur = jnp.stack(ys, axis=1)
        hs.append(h)
        cs.append(c)
    ay = jnp.abs(cur)
    idx = jnp.argmax(ay, axis=1)
    pooled = jnp.take_along_axis(cur, idx[:, None, :], axis=1)[:, 0, :]
    logits = pooled @ fc_w_t + fc_b
    return jax.nn.log_softmax(logits, axis=1), (jnp.stack(hs), jnp.stack(cs))


# --------------------------------- main --------------------------------------

if __name__ == "__main__":
    B, T, D, H, L, C = 2, 8, 16, HIDDEN_DIM, LSTM_LAYERS, 7

    key = jax.random.PRNGKey(0)
    kx, kp = jax.random.split(key)
    x = jax.random.normal(kx, (B, T, D), jnp.float32)
    x_seq_lengths = jnp.array([8, 5], jnp.int32)

    layer_params, fc_w_t, fc_b = init_params(kp, D, C, H, L)

    log_probs, (hidden, cell) = lstm_model_forward(x, x_seq_lengths, layer_params, fc_w_t, fc_b)
    jax.block_until_ready((log_probs, hidden, cell))

    ref_lp, (ref_h, ref_c) = reference_forward(x, x_seq_lengths, layer_params, fc_w_t, fc_b)
    assert jnp.allclose(log_probs, ref_lp, atol=1e-4, rtol=1e-4), "log_probs mismatch"
    assert jnp.allclose(hidden, ref_h, atol=1e-4, rtol=1e-4), "hidden mismatch"
    assert jnp.allclose(cell, ref_c, atol=1e-4, rtol=1e-4), "cell mismatch"

    print("KERNEL_OK")
</pallas_src>

<mosaic_0001>
module attributes {stable_mosaic.version = 11 : i64} {
  func.func @kernel(%arg0: memref<64x16xf32, #tpu.memory_space<vmem>>, %arg1: memref<8x1xi32, #tpu.memory_space<vmem>>, %arg2: memref<168x128xf32, #tpu.memory_space<vmem>>, %arg3: memref<8x128xf32, #tpu.memory_space<vmem>>, %arg4: memref<8x128xf32, #tpu.memory_space<vmem>>) attributes {dimension_semantics = [], scalar_prefetch = 0 : i64, scratch_operands = 0 : i64, tpu.core_type = #tpu.core_type<tc>} {
    %c0 = arith.constant 0 : index
    %c0_0 = arith.constant 0 : index
    %0 = vector.load %arg1[%c0, %c0_0] : memref<8x1xi32, #tpu.memory_space<vmem>>, vector<8x1xi32>
    %1 = tpu.iota {dimensions = array<i32: 1>} : vector<8x128xi32>
    %c96_i32 = arith.constant 96 : i32
    %2 = vector.broadcast %c96_i32 : i32 to vector<8x128xi32>
    %3 = arith.cmpi slt, %1, %2 : vector<8x128xi32>
    %c0_1 = arith.constant 0 : index
    %c0_2 = arith.constant 0 : index
    %4 = vector.load %arg2[%c0_1, %c0_2] : memref<168x128xf32, #tpu.memory_space<vmem>>, vector<16x128xf32>
    %c16 = arith.constant 16 : index
    %c0_3 = arith.constant 0 : index
    %5 = vector.load %arg2[%c16, %c0_3] : memref<168x128xf32, #tpu.memory_space<vmem>>, vector<32x128xf32>
    %c48 = arith.constant 48 : index
    %c0_4 = arith.constant 0 : index
    %6 = vector.load %arg2[%c48, %c0_4] : memref<168x128xf32, #tpu.memory_space<vmem>>, vector<1x128xf32>
    %c56 = arith.constant 56 : index
    %c0_5 = arith.constant 0 : index
    %7 = vector.load %arg2[%c56, %c0_5] : memref<168x128xf32, #tpu.memory_space<vmem>>, vector<32x128xf32>
    %c88 = arith.constant 88 : index
    %c0_6 = arith.constant 0 : index
    %8 = vector.load %arg2[%c88, %c0_6] : memref<168x128xf32, #tpu.memory_space<vmem>>, vector<32x128xf32>
    %c120 = arith.constant 120 : index
    %c0_7 = arith.constant 0 : index
    %9 = vector.load %arg2[%c120, %c0_7] : memref<168x128xf32, #tpu.memory_space<vmem>>, vector<1x128xf32>
    %c128 = arith.constant 128 : index
    %c0_8 = arith.constant 0 : index
    %10 = vector.load %arg2[%c128, %c0_8] : memref<168x128xf32, #tpu.memory_space<vmem>>, vector<32x128xf32>
    %c160 = arith.constant 160 : index
    %c0_9 = arith.constant 0 : index
    %11 = vector.load %arg2[%c160, %c0_9] : memref<168x128xf32, #tpu.memory_space<vmem>>, vector<1x128xf32>
    %cst = arith.constant 0.000000e+00 : f32
    %12 = vector.broadcast %cst : f32 to vector<8x32xf32>
    %cst_10 = arith.constant 0.000000e+00 : f32
    %13 = vector.broadcast %cst_10 : f32 to vector<8x32xf32>
    %cst_11 = arith.constant 0.000000e+00 : f32
    %14 = vector.broadcast %cst_11 : f32 to vector<8x32xf32>
    %cst_12 = arith.constant 0.000000e+00 : f32
    %15 = vector.broadcast %cst_12 : f32 to vector<8x32xf32>
    %c0_13 = arith.constant 0 : index
    %c0_14 = arith.constant 0 : index
    %16 = vector.load %arg0[%c0_13, %c0_14] : memref<64x16xf32, #tpu.memory_space<vmem>>, vector<64x16xf32>
    %cst_15 = arith.constant dense<0.000000e+00> : vector<64x128xf32>
    %17 = tpu.matmul %16, %4, %cst_15 {dimension_numbers = #tpu.dot_dimension_numbers<[1], [0], [0], [1], [0, 0, 1, 1], [], []>} : vector<64x16xf32>, vector<16x128xf32>, vector<64x128xf32> -> vector<64x128xf32>
    %18 = vector.broadcast %6 : vector<1x128xf32> to vector<64x128xf32>
    %19 = arith.addf %17, %18 : vector<64x128xf32>
    %c0_i32 = arith.constant 0 : i32
    %20 = vector.broadcast %c0_i32 : i32 to vector<8x1xi32>
    %21 = arith.cmpi sgt, %0, %20 : vector<8x1xi32>
    %22 = vector.extract_strided_slice %19 {offsets = [0, 0], sizes = [8, 128], strides = [1, 1]} : vector<64x128xf32> to vector<8x128xf32>
    %cst_16 = arith.constant dense<0.000000e+00> : vector<8x128xf32>
    %23 = tpu.matmul %12, %5, %cst_16 {dimension_numbers = #tpu.dot_dimension_numbers<[1], [0], [0], [1], [0, 0, 1, 1], [], []>} : vector<8x32xf32>, vector<32x128xf32>, vector<8x128xf32> -> vector<8x128xf32>
    %24 = arith.addf %22, %23 : vector<8x128xf32>
    %25 = arith.negf %24 : vector<8x128xf32>
    %26 = math.exp %25 : vector<8x128xf32>
    %cst_17 = arith.constant 1.000000e+00 : f32
    %27 = vector.broadcast %cst_17 : f32 to vector<8x128xf32>
    %28 = arith.addf %27, %26 : vector<8x128xf32>
    %29 = arith.divf %27, %28 : vector<8x128xf32>
    %30 = math.tanh %24 : vector<8x128xf32>
    %31 = arith.select %3, %29, %30 : vector<8x128xi1>, vector<8x128xf32>
    %32 = vector.extract_strided_slice %31 {offsets = [0, 0], sizes = [8, 32], strides = [1, 1]} : vector<8x128xf32> to vector<8x32xf32>
    %33 = vector.extract_strided_slice %31 {offsets = [0, 32], sizes = [8, 32], strides = [1, 1]} : vector<8x128xf32> to vector<8x32xf32>
    %34 = vector.extract_strided_slice %31 {offsets = [0, 64], sizes = [8, 32], strides = [1, 1]} : vector<8x128xf32> to vector<8x32xf32>
    %35 = vector.extract_strided_slice %31 {offsets = [0, 96], sizes = [8, 32], strides = [1, 1]} : vector<8x128xf32> to vector<8x32xf32>
    %36 = arith.mulf %33, %14 : vector<8x32xf32>
    %37 = arith.mulf %32, %35 : vector<8x32xf32>
    %38 = arith.addf %36, %37 : vector<8x32xf32>
    %39 = math.tanh %38 : vector<8x32xf32>
    %40 = arith.mulf %34, %39 : vector<8x32xf32>
    %41 = vector.shape_cast %21 : vector<8x1xi1> to vector<8x1xi1>
    %42 = vector.broadcast %41 : vector<8x1xi1> to vector<8x32xi1>
    %43 = arith.select %42, %40, %12 : vector<8x32xi1>, vector<8x32xf32>
    %44 = vector.shape_cast %21 : vector<8x1xi1> to vector<8x1xi1>
    %45 = vector.broadcast %44 : vector<8x1xi1> to vector<8x32xi1>
    %46 = arith.select %45, %38, %14 : vector<8x32xi1>, vector<8x32xf32>
    %cst_18 = arith.constant 0.000000e+00 : f32
    %47 = vector.broadcast %cst_18 : f32 to vector<8x32xf32>
    %48 = vector.shape_cast %21 : vector<8x1xi1> to vector<8x1xi1>
    %49 = vector.broadcast %48 : vector<8x1xi1> to vector<8x32xi1>
    %50 = arith.select %49, %40, %47 : vector<8x32xi1>, vector<8x32xf32>
    %cst_19 = arith.constant dense<0.000000e+00> : vector<8x128xf32>
    %51 = tpu.matmul %50, %7, %cst_19 {dimension_numbers = #tpu.dot_dimension_numbers<[1], [0], [0], [1], [0, 0, 1, 1], [], []>} : vector<8x32xf32>, vector<32x128xf32>, vector<8x128xf32> -> vector<8x128xf32>
    %52 = vector.broadcast %9 : vector<1x128xf32> to vector<8x128xf32>
    %53 = arith.addf %52, %51 : vector<8x128xf32>
    %cst_20 = arith.constant dense<0.000000e+00> : vector<8x128xf32>
    %54 = tpu.matmul %13, %8, %cst_20 {dimension_numbers = #tpu.dot_dimension_numbers<[1], [0], [0], [1], [0, 0, 1, 1], [], []>} : vector<8x32xf32>, vector<32x128xf32>, vector<8x128xf32> -> vector<8x128xf32>
    %55 = arith.addf %53, %54 : vector<8x128xf32>
    %56 = arith.negf %55 : vector<8x128xf32>
    %57 = math.exp %56 : vector<8x128xf32>
    %cst_21 = arith.constant 1.000000e+00 : f32
    %58 = vector.broadcast %cst_21 : f32 to vector<8x128xf32>
    %59 = arith.addf %58, %57 : vector<8x128xf32>
    %60 = arith.divf %58, %59 : vector<8x128xf32>
    %61 = math.tanh %55 : vector<8x128xf32>
    %62 = arith.select %3, %60, %61 : vector<8x128xi1>, vector<8x128xf32>
    %63 = vector.extract_strided_slice %62 {offsets = [0, 0], sizes = [8, 32], strides = [1, 1]} : vector<8x128xf32> to vector<8x32xf32>
    %64 = vector.extract_strided_slice %62 {offsets = [0, 32], sizes = [8, 32], strides = [1, 1]} : vector<8x128xf32> to vector<8x32xf32>
    %65 = vector.extract_strided_slice %62 {offsets = [0, 64], sizes = [8, 32], strides = [1, 1]} : vector<8x128xf32> to vector<8x32xf32>
    %66 = vector.extract_strided_slice %62 {offsets = [0, 96], sizes = [8, 32], strides = [1, 1]} : vector<8x128xf32> to vector<8x32xf32>
    %67 = arith.mulf %64, %15 : vector<8x32xf32>
    %68 = arith.mulf %63, %66 : vector<8x32xf32>
    %69 = arith.addf %67, %68 : vector<8x32xf32>
    %70 = math.tanh %69 : vector<8x32xf32>
    %71 = arith.mulf %65, %70 : vector<8x32xf32>
    %72 = vector.shape_cast %21 : vector<8x1xi1> to vector<8x1xi1>
    %73 = vector.broadcast %72 : vector<8x1xi1> to vector<8x32xi1>
    %74 = arith.select %73, %71, %13 : vector<8x32xi1>, vector<8x32xf32>
    %75 = vector.shape_cast %21 : vector<8x1xi1> to vector<8x1xi1>
    %76 = vector.broadcast %75 : vector<8x1xi1> to vector<8x32xi1>
    %77 = arith.select %76, %69, %15 : vector<8x32xi1>, vector<8x32xf32>
    %cst_22 = arith.constant 0.000000e+00 : f32
    %78 = vector.broadcast %cst_22 : f32 to vector<8x32xf32>
    %79 = vector.shape_cast %21 : vector<8x1xi1> to vector<8x1xi1>
    %80 = vector.broadcast %79 : vector<8x1xi1> to vector<8x32xi1>
    %81 = arith.select %80, %71, %78 : vector<8x32xi1>, vector<8x32xf32>
    %82 = math.absf %81 : vector<8x32xf32>
    %c1_i32 = arith.constant 1 : i32
    %83 = vector.broadcast %c1_i32 : i32 to vector<8x1xi32>
    %84 = arith.cmpi sgt, %0, %83 : vector<8x1xi32>
    %85 = vector.extract_strided_slice %19 {offsets = [8, 0], sizes = [8, 128], strides = [1, 1]} : vector<64x128xf32> to vector<8x128xf32>
    %cst_23 = arith.constant dense<0.000000e+00> : vector<8x128xf32>
    %86 = tpu.matmul %43, %5, %cst_23 {dimension_numbers = #tpu.dot_dimension_numbers<[1], [0], [0], [1], [0, 0, 1, 1], [], []>} : vector<8x32xf32>, vector<32x128xf32>, vector<8x128xf32> -> vector<8x128xf32>
    %87 = arith.addf %85, %86 : vector<8x128xf32>
    %88 = arith.negf %87 : vector<8x128xf32>
    %89 = math.exp %88 : vector<8x128xf32>
    %cst_24 = arith.constant 1.000000e+00 : f32
    %90 = vector.broadcast %cst_24 : f32 to vector<8x128xf32>
    %91 = arith.addf %90, %89 : vector<8x128xf32>
    %92 = arith.divf %90, %91 : vector<8x128xf32>
    %93 = math.tanh %87 : vector<8x128xf32>
    %94 = arith.select %3, %92, %93 : vector<8x128xi1>, vector<8x128xf32>
    %95 = vector.extract_strided_slice %94 {offsets = [0, 0], sizes = [8, 32], strides = [1, 1]} : vector<8x128xf32> to vector<8x32xf32>
    %96 = vector.extract_strided_slice %94 {offsets = [0, 32], sizes = [8, 32], strides = [1, 1]} : vector<8x128xf32> to vector<8x32xf32>
    %97 = vector.extract_strided_slice %94 {offsets = [0, 64], sizes = [8, 32], strides = [1, 1]} : vector<8x128xf32> to vector<8x32xf32>
    %98 = vector.extract_strided_slice %94 {offsets = [0, 96], sizes = [8, 32], strides = [1, 1]} : vector<8x128xf32> to vector<8x32xf32>
    %99 = arith.mulf %96, %46 : vector<8x32xf32>
    %100 = arith.mulf %95, %98 : vector<8x32xf32>
    %101 = arith.addf %99, %100 : vector<8x32xf32>
    %102 = math.tanh %101 : vector<8x32xf32>
    %103 = arith.mulf %97, %102 : vector<8x32xf32>
    %104 = vector.shape_cast %84 : vector<8x1xi1> to vector<8x1xi1>
    %105 = vector.broadcast %104 : vector<8x1xi1> to vector<8x32xi1>
    %106 = arith.select %105, %103, %43 : vector<8x32xi1>, vector<8x32xf32>
    %107 = vector.shape_cast %84 : vector<8x1xi1> to vector<8x1xi1>
    %108 = vector.broadcast %107 : vector<8x1xi1> to vector<8x32xi1>
    %109 = arith.select %108, %101, %46 : vector<8x32xi1>, vector<8x32xf32>
    %cst_25 = arith.constant 0.000000e+00 : f32
    %110 = vector.broadcast %cst_25 : f32 to vector<8x32xf32>
    %111 = vector.shape_cast %84 : vector<8x1xi1> to vector<8x1xi1>
    %112 = vector.broadcast %111 : vector<8x1xi1> to vector<8x32xi1>
    %113 = arith.select %112, %103, %110 : vector<8x32xi1>, vector<8x32xf32>
    %cst_26 = arith.constant dense<0.000000e+00> : vector<8x128xf32>
    %114 = tpu.matmul %113, %7, %cst_26 {dimension_numbers = #tpu.dot_dimension_numbers<[1], [0], [0], [1], [0, 0, 1, 1], [], []>} : vector<8x32xf32>, vector<32x128xf32>, vector<8x128xf32> -> vector<8x128xf32>
    %115 = vector.broadcast %9 : vector<1x128xf32> to vector<8x128xf32>
    %116 = arith.addf %115, %114 : vector<8x128xf32>
    %cst_27 = arith.constant dense<0.000000e+00> : vector<8x128xf32>
    %117 = tpu.matmul %74, %8, %cst_27 {dimension_numbers = #tpu.dot_dimension_numbers<[1], [0], [0], [1], [0, 0, 1, 1], [], []>} : vector<8x32xf32>, vector<32x128xf32>, vector<8x128xf32> -> vector<8x128xf32>
    %118 = arith.addf %116, %117 : vector<8x128xf32>
    %119 = arith.negf %118 : vector<8x128xf32>
    %120 = math.exp %119 : vector<8x128xf32>
    %cst_28 = arith.constant 1.000000e+00 : f32
    %121 = vector.broadcast %cst_28 : f32 to vector<8x128xf32>
    %122 = arith.addf %121, %120 : vector<8x128xf32>
    %123 = arith.divf %121, %122 : vector<8x128xf32>
    %124 = math.tanh %118 : vector<8x128xf32>
    %125 = arith.select %3, %123, %124 : vector<8x128xi1>, vector<8x128xf32>
    %126 = vector.extract_strided_slice %125 {offsets = [0, 0], sizes = [8, 32], strides = [1, 1]} : vector<8x128xf32> to vector<8x32xf32>
    %127 = vector.extract_strided_slice %125 {offsets = [0, 32], sizes = [8, 32], strides = [1, 1]} : vector<8x128xf32> to vector<8x32xf32>
    %128 = vector.extract_strided_slice %125 {offsets = [0, 64], sizes = [8, 32], strides = [1, 1]} : vector<8x128xf32> to vector<8x32xf32>
    %129 = vector.extract_strided_slice %125 {offsets = [0, 96], sizes = [8, 32], strides = [1, 1]} : vector<8x128xf32> to vector<8x32xf32>
    %130 = arith.mulf %127, %77 : vector<8x32xf32>
    %131 = arith.mulf %126, %129 : vector<8x32xf32>
    %132 = arith.addf %130, %131 : vector<8x32xf32>
    %133 = math.tanh %132 : vector<8x32xf32>
    %134 = arith.mulf %128, %133 : vector<8x32xf32>
    %135 = vector.shape_cast %84 : vector<8x1xi1> to vector<8x1xi1>
    %136 = vector.broadcast %135 : vector<8x1xi1> to vector<8x32xi1>
    %137 = arith.select %136, %134, %74 : vector<8x32xi1>, vector<8x32xf32>
    %138 = vector.shape_cast %84 : vector<8x1xi1> to vector<8x1xi1>
    %139 = vector.broadcast %138 : vector<8x1xi1> to vector<8x32xi1>
    %140 = arith.select %139, %132, %77 : vector<8x32xi1>, vector<8x32xf32>
    %cst_29 = arith.constant 0.000000e+00 : f32
    %141 = vector.broadcast %cst_29 : f32 to vector<8x32xf32>
    %142 = vector.shape_cast %84 : vector<8x1xi1> to vector<8x1xi1>
    %143 = vector.broadcast %142 : vector<8x1xi1> to vector<8x32xi1>
    %144 = arith.select %143, %134, %141 : vector<8x32xi1>, vector<8x32xf32>
    %145 = math.absf %144 : vector<8x32xf32>
    %146 = arith.cmpf ogt, %145, %82 : vector<8x32xf32>
    %147 = arith.select %146, %144, %81 : vector<8x32xi1>, vector<8x32xf32>
    %148 = arith.select %146, %145, %82 : vector<8x32xi1>, vector<8x32xf32>
    %c2_i32 = arith.constant 2 : i32
    %149 = vector.broadcast %c2_i32 : i32 to vector<8x1xi32>
    %150 = arith.cmpi sgt, %0, %149 : vector<8x1xi32>
    %151 = vector.extract_strided_slice %19 {offsets = [16, 0], sizes = [8, 128], strides = [1, 1]} : vector<64x128xf32> to vector<8x128xf32>
    %cst_30 = arith.constant dense<0.000000e+00> : vector<8x128xf32>
    %152 = tpu.matmul %106, %5, %cst_30 {dimension_numbers = #tpu.dot_dimension_numbers<[1], [0], [0], [1], [0, 0, 1, 1], [], []>} : vector<8x32xf32>, vector<32x128xf32>, vector<8x128xf32> -> vector<8x128xf32>
    %153 = arith.addf %151, %152 : vector<8x128xf32>
    %154 = arith.negf %153 : vector<8x128xf32>
    %155 = math.exp %154 : vector<8x128xf32>
    %cst_31 = arith.constant 1.000000e+00 : f32
    %156 = vector.broadcast %cst_31 : f32 to vector<8x128xf32>
    %157 = arith.addf %156, %155 : vector<8x128xf32>
    %158 = arith.divf %156, %157 : vector<8x128xf32>
    %159 = math.tanh %153 : vector<8x128xf32>
    %160 = arith.select %3, %158, %159 : vector<8x128xi1>, vector<8x128xf32>
    %161 = vector.extract_strided_slice %160 {offsets = [0, 0], sizes = [8, 32], strides = [1, 1]} : vector<8x128xf32> to vector<8x32xf32>
    %162 = vector.extract_strided_slice %160 {offsets = [0, 32], sizes = [8, 32], strides = [1, 1]} : vector<8x128xf32> to vector<8x32xf32>
    %163 = vector.extract_strided_slice %160 {offsets = [0, 64], sizes = [8, 32], strides = [1, 1]} : vector<8x128xf32> to vector<8x32xf32>
    %164 = vector.extract_strided_slice %160 {offsets = [0, 96], sizes = [8, 32], strides = [1, 1]} : vector<8x128xf32> to vector<8x32xf32>
    %165 = arith.mulf %162, %109 : vector<8x32xf32>
    %166 = arith.mulf %161, %164 : vector<8x32xf32>
    %167 = arith.addf %165, %166 : vector<8x32xf32>
    %168 = math.tanh %167 : vector<8x32xf32>
    %169 = arith.mulf %163, %168 : vector<8x32xf32>
    %170 = vector.shape_cast %150 : vector<8x1xi1> to vector<8x1xi1>
    %171 = vector.broadcast %170 : vector<8x1xi1> to vector<8x32xi1>
    %172 = arith.select %171, %169, %106 : vector<8x32xi1>, vector<8x32xf32>
    %173 = vector.shape_cast %150 : vector<8x1xi1> to vector<8x1xi1>
    %174 = vector.broadcast %173 : vector<8x1xi1> to vector<8x32xi1>
    %175 = arith.select %174, %167, %109 : vector<8x32xi1>, vector<8x32xf32>
    %cst_32 = arith.constant 0.000000e+00 : f32
    %176 = vector.broadcast %cst_32 : f32 to vector<8x32xf32>
    %177 = vector.shape_cast %150 : vector<8x1xi1> to vector<8x1xi1>
    %178 = vector.broadcast %177 : vector<8x1xi1> to vector<8x32xi1>
    %179 = arith.select %178, %169, %176 : vector<8x32xi1>, vector<8x32xf32>
    %cst_33 = arith.constant dense<0.000000e+00> : vector<8x128xf32>
    %180 = tpu.matmul %179, %7, %cst_33 {dimension_numbers = #tpu.dot_dimension_numbers<[1], [0], [0], [1], [0, 0, 1, 1], [], []>} : vector<8x32xf32>, vector<32x128xf32>, vector<8x128xf32> -> vector<8x128xf32>
    %181 = vector.broadcast %9 : vector<1x128xf32> to vector<8x128xf32>
    %182 = arith.addf %181, %180 : vector<8x128xf32>
    %cst_34 = arith.constant dense<0.000000e+00> : vector<8x128xf32>
    %183 = tpu.matmul %137, %8, %cst_34 {dimension_numbers = #tpu.dot_dimension_numbers<[1], [0], [0], [1], [0, 0, 1, 1], [], []>} : vector<8x32xf32>, vector<32x128xf32>, vector<8x128xf32> -> vector<8x128xf32>
    %184 = arith.addf %182, %183 : vector<8x128xf32>
    %185 = arith.negf %184 : vector<8x128xf32>
    %186 = math.exp %185 : vector<8x128xf32>
    %cst_35 = arith.constant 1.000000e+00 : f32
    %187 = vector.broadcast %cst_35 : f32 to vector<8x128xf32>
    %188 = arith.addf %187, %186 : vector<8x128xf32>
    %189 = arith.divf %187, %188 : vector<8x128xf32>
    %190 = math.tanh %184 : vector<8x128xf32>
    %191 = arith.select %3, %189, %190 : vector<8x128xi1>, vector<8x128xf32>
    %192 = vector.extract_strided_slice %191 {offsets = [0, 0], sizes = [8, 32], strides = [1, 1]} : vector<8x128xf32> to vector<8x32xf32>
    %193 = vector.extract_strided_slice %191 {offsets = [0, 32], sizes = [8, 32], strides = [1, 1]} : vector<8x128xf32> to vector<8x32xf32>
    %194 = vector.extract_strided_slice %191 {offsets = [0, 64], sizes = [8, 32], strides = [1, 1]} : vector<8x128xf32> to vector<8x32xf32>
    %195 = vector.extract_strided_slice %191 {offsets = [0, 96], sizes = [8, 32], strides = [1, 1]} : vector<8x128xf32> to vector<8x32xf32>
    %196 = arith.mulf %193, %140 : vector<8x32xf32>
    %197 = arith.mulf %192, %195 : vector<8x32xf32>
    %198 = arith.addf %196, %197 : vector<8x32xf32>
    %199 = math.tanh %198 : vector<8x32xf32>
    %200 = arith.mulf %194, %199 : vector<8x32xf32>
    %201 = vector.shape_cast %150 : vector<8x1xi1> to vector<8x1xi1>
    %202 = vector.broadcast %201 : vector<8x1xi1> to vector<8x32xi1>
    %203 = arith.select %202, %200, %137 : vector<8x32xi1>, vector<8x32xf32>
    %204 = vector.shape_cast %150 : vector<8x1xi1> to vector<8x1xi1>
    %205 = vector.broadcast %204 : vector<8x1xi1> to vector<8x32xi1>
    %206 = arith.select %205, %198, %140 : vector<8x32xi1>, vector<8x32xf32>
    %cst_36 = arith.constant 0.000000e+00 : f32
    %207 = vector.broadcast %cst_36 : f32 to vector<8x32xf32>
    %208 = vector.shape_cast %150 : vector<8x1xi1> to vector<8x1xi1>
    %209 = vector.broadcast %208 : vector<8x1xi1> to vector<8x32xi1>
    %210 = arith.select %209, %200, %207 : vector<8x32xi1>, vector<8x32xf32>
    %211 = math.absf %210 : vector<8x32xf32>
    %212 = arith.cmpf ogt, %211, %148 : vector<8x32xf32>
    %213 = arith.select %212, %210, %147 : vector<8x32xi1>, vector<8x32xf32>
    %214 = arith.select %212, %211, %148 : vector<8x32xi1>, vector<8x32xf32>
    %c3_i32 = arith.constant 3 : i32
    %215 = vector.broadcast %c3_i32 : i32 to vector<8x1xi32>
    %216 = arith.cmpi sgt, %0, %215 : vector<8x1xi32>
    %217 = vector.extract_strided_slice %19 {offsets = [24, 0], sizes = [8, 128], strides = [1, 1]} : vector<64x128xf32> to vector<8x128xf32>
    %cst_37 = arith.constant dense<0.000000e+00> : vector<8x128xf32>
    %218 = tpu.matmul %172, %5, %cst_37 {dimension_numbers = #tpu.dot_dimension_numbers<[1], [0], [0], [1], [0, 0, 1, 1], [], []>} : vector<8x32xf32>, vector<32x128xf32>, vector<8x128xf32> -> vector<8x128xf32>
    %219 = arith.addf %217, %218 : vector<8x128xf32>
    %220 = arith.negf %219 : vector<8x128xf32>
    %221 = math.exp %220 : vector<8x128xf32>
    %cst_38 = arith.constant 1.000000e+00 : f32
    %222 = vector.broadcast %cst_38 : f32 to vector<8x128xf32>
    %223 = arith.addf %222, %221 : vector<8x128xf32>
    %224 = arith.divf %222, %223 : vector<8x128xf32>
    %225 = math.tanh %219 : vector<8x128xf32>
    %226 = arith.select %3, %224, %225 : vector<8x128xi1>, vector<8x128xf32>
    %227 = vector.extract_strided_slice %226 {offsets = [0, 0], sizes = [8, 32], strides = [1, 1]} : vector<8x128xf32> to vector<8x32xf32>
    %228 = vector.extract_strided_slice %226 {offsets = [0, 32], sizes = [8, 32], strides = [1, 1]} : vector<8x128xf32> to vector<8x32xf32>
    %229 = vector.extract_strided_slice %226 {offsets = [0, 64], sizes = [8, 32], strides = [1, 1]} : vector<8x128xf32> to vector<8x32xf32>
    %230 = vector.extract_strided_slice %226 {offsets = [0, 96], sizes = [8, 32], strides = [1, 1]} : vector<8x128xf32> to vector<8x32xf32>
    %231 = arith.mulf %228, %175 : vector<8x32xf32>
    %232 = arith.mulf %227, %230 : vector<8x32xf32>
    %233 = arith.addf %231, %232 : vector<8x32xf32>
    %234 = math.tanh %233 : vector<8x32xf32>
    %235 = arith.mulf %229, %234 : vector<8x32xf32>
    %236 = vector.shape_cast %216 : vector<8x1xi1> to vector<8x1xi1>
    %237 = vector.broadcast %236 : vector<8x1xi1> to vector<8x32xi1>
    %238 = arith.select %237, %235, %172 : vector<8x32xi1>, vector<8x32xf32>
    %239 = vector.shape_cast %216 : vector<8x1xi1> to vector<8x1xi1>
    %240 = vector.broadcast %239 : vector<8x1xi1> to vector<8x32xi1>
    %241 = arith.select %240, %233, %175 : vector<8x32xi1>, vector<8x32xf32>
    %cst_39 = arith.constant 0.000000e+00 : f32
    %242 = vector.broadcast %cst_39 : f32 to vector<8x32xf32>
    %243 = vector.shape_cast %216 : vector<8x1xi1> to vector<8x1xi1>
    %244 = vector.broadcast %243 : vector<8x1xi1> to vector<8x32xi1>
    %245 = arith.select %244, %235, %242 : vector<8x32xi1>, vector<8x32xf32>
    %cst_40 = arith.constant dense<0.000000e+00> : vector<8x128xf32>
    %246 = tpu.matmul %245, %7, %cst_40 {dimension_numbers = #tpu.dot_dimension_numbers<[1], [0], [0], [1], [0, 0, 1, 1], [], []>} : vector<8x32xf32>, vector<32x128xf32>, vector<8x128xf32> -> vector<8x128xf32>
    %247 = vector.broadcast %9 : vector<1x128xf32> to vector<8x128xf32>
    %248 = arith.addf %247, %246 : vector<8x128xf32>
    %cst_41 = arith.constant dense<0.000000e+00> : vector<8x128xf32>
    %249 = tpu.matmul %203, %8, %cst_41 {dimension_numbers = #tpu.dot_dimension_numbers<[1], [0], [0], [1], [0, 0, 1, 1], [], []>} : vector<8x32xf32>, vector<32x128xf32>, vector<8x128xf32> -> vector<8x128xf32>
    %250 = arith.addf %248, %249 : vector<8x128xf32>
    %251 = arith.negf %250 : vector<8x128xf32>
    %252 = math.exp %251 : vector<8x128xf32>
    %cst_42 = arith.constant 1.000000e+00 : f32
    %253 = vector.broadcast %cst_42 : f32 to vector<8x128xf32>
    %254 = arith.addf %253, %252 : vector<8x128xf32>
    %255 = arith.divf %253, %254 : vector<8x128xf32>
    %256 = math.tanh %250 : vector<8x128xf32>
    %257 = arith.select %3, %255, %256 : vector<8x128xi1>, vector<8x128xf32>
    %258 = vector.extract_strided_slice %257 {offsets = [0, 0], sizes = [8, 32], strides = [1, 1]} : vector<8x128xf32> to vector<8x32xf32>
    %259 = vector.extract_strided_slice %257 {offsets = [0, 32], sizes = [8, 32], strides = [1, 1]} : vector<8x128xf32> to vector<8x32xf32>
    %260 = vector.extract_strided_slice %257 {offsets = [0, 64], sizes = [8, 32], strides = [1, 1]} : vector<8x128xf32> to vector<8x32xf32>
    %261 = vector.extract_strided_slice %257 {offsets = [0, 96], sizes = [8, 32], strides = [1, 1]} : vector<8x128xf32> to vector<8x32xf32>
    %262 = arith.mulf %259, %206 : vector<8x32xf32>
    %263 = arith.mulf %258, %261 : vector<8x32xf32>
    %264 = arith.addf %262, %263 : vector<8x32xf32>
    %265 = math.tanh %264 : vector<8x32xf32>
    %266 = arith.mulf %260, %265 : vector<8x32xf32>
    %267 = vector.shape_cast %216 : vector<8x1xi1> to vector<8x1xi1>
    %268 = vector.broadcast %267 : vector<8x1xi1> to vector<8x32xi1>
    %269 = arith.select %268, %266, %203 : vector<8x32xi1>, vector<8x32xf32>
    %270 = vector.shape_cast %216 : vector<8x1xi1> to vector<8x1xi1>
    %271 = vector.broadcast %270 : vector<8x1xi1> to vector<8x32xi1>
    %272 = arith.select %271, %264, %206 : vector<8x32xi1>, vector<8x32xf32>
    %cst_43 = arith.constant 0.000000e+00 : f32
    %273 = vector.broadcast %cst_43 : f32 to vector<8x32xf32>
    %274 = vector.shape_cast %216 : vector<8x1xi1> to vector<8x1xi1>
    %275 = vector.broadcast %274 : vector<8x1xi1> to vector<8x32xi1>
    %276 = arith.select %275, %266, %273 : vector<8x32xi1>, vector<8x32xf32>
    %277 = math.absf %276 : vector<8x32xf32>
    %278 = arith.cmpf ogt, %277, %214 : vector<8x32xf32>
    %279 = arith.select %278, %276, %213 : vector<8x32xi1>, vector<8x32xf32>
    %280 = arith.select %278, %277, %214 : vector<8x32xi1>, vector<8x32xf32>
    %c4_i32 = arith.constant 4 : i32
    %281 = vector.broadcast %c4_i32 : i32 to vector<8x1xi32>
    %282 = arith.cmpi sgt, %0, %281 : vector<8x1xi32>
    %283 = vector.extract_strided_slice %19 {offsets = [32, 0], sizes = [8, 128], strides = [1, 1]} : vector<64x128xf32> to vector<8x128xf32>
    %cst_44 = arith.constant dense<0.000000e+00> : vector<8x128xf32>
    %284 = tpu.matmul %238, %5, %cst_44 {dimension_numbers = #tpu.dot_dimension_numbers<[1], [0], [0], [1], [0, 0, 1, 1], [], []>} : vector<8x32xf32>, vector<32x128xf32>, vector<8x128xf32> -> vector<8x128xf32>
    %285 = arith.addf %283, %284 : vector<8x128xf32>
    %286 = arith.negf %285 : vector<8x128xf32>
    %287 = math.exp %286 : vector<8x128xf32>
    %cst_45 = arith.constant 1.000000e+00 : f32
    %288 = vector.broadcast %cst_45 : f32 to vector<8x128xf32>
    %289 = arith.addf %288, %287 : vector<8x128xf32>
    %290 = arith.divf %288, %289 : vector<8x128xf32>
    %291 = math.tanh %285 : vector<8x128xf32>
    %292 = arith.select %3, %290, %291 : vector<8x128xi1>, vector<8x128xf32>
    %293 = vector.extract_strided_slice %292 {offsets = [0, 0], sizes = [8, 32], strides = [1, 1]} : vector<8x128xf32> to vector<8x32xf32>
    %294 = vector.extract_strided_slice %292 {offsets = [0, 32], sizes = [8, 32], strides = [1, 1]} : vector<8x128xf32> to vector<8x32xf32>
    %295 = vector.extract_strided_slice %292 {offsets = [0, 64], sizes = [8, 32], strides = [1, 1]} : vector<8x128xf32> to vector<8x32xf32>
    %296 = vector.extract_strided_slice %292 {offsets = [0, 96], sizes = [8, 32], strides = [1, 1]} : vector<8x128xf32> to vector<8x32xf32>
    %297 = arith.mulf %294, %241 : vector<8x32xf32>
    %298 = arith.mulf %293, %296 : vector<8x32xf32>
    %299 = arith.addf %297, %298 : vector<8x32xf32>
    %300 = math.tanh %299 : vector<8x32xf32>
    %301 = arith.mulf %295, %300 : vector<8x32xf32>
    %302 = vector.shape_cast %282 : vector<8x1xi1> to vector<8x1xi1>
    %303 = vector.broadcast %302 : vector<8x1xi1> to vector<8x32xi1>
    %304 = arith.select %303, %301, %238 : vector<8x32xi1>, vector<8x32xf32>
    %305 = vector.shape_cast %282 : vector<8x1xi1> to vector<8x1xi1>
    %306 = vector.broadcast %305 : vector<8x1xi1> to vector<8x32xi1>
    %307 = arith.select %306, %299, %241 : vector<8x32xi1>, vector<8x32xf32>
    %cst_46 = arith.constant 0.000000e+00 : f32
    %308 = vector.broadcast %cst_46 : f32 to vector<8x32xf32>
    %309 = vector.shape_cast %282 : vector<8x1xi1> to vector<8x1xi1>
    %310 = vector.broadcast %309 : vector<8x1xi1> to vector<8x32xi1>
    %311 = arith.select %310, %301, %308 : vector<8x32xi1>, vector<8x32xf32>
    %cst_47 = arith.constant dense<0.000000e+00> : vector<8x128xf32>
    %312 = tpu.matmul %311, %7, %cst_47 {dimension_numbers = #tpu.dot_dimension_numbers<[1], [0], [0], [1], [0, 0, 1, 1], [], []>} : vector<8x32xf32>, vector<32x128xf32>, vector<8x128xf32> -> vector<8x128xf32>
    %313 = vector.broadcast %9 : vector<1x128xf32> to vector<8x128xf32>
    %314 = arith.addf %313, %312 : vector<8x128xf32>
    %cst_48 = arith.constant dense<0.000000e+00> : vector<8x128xf32>
    %315 = tpu.matmul %269, %8, %cst_48 {dimension_numbers = #tpu.dot_dimension_numbers<[1], [0], [0], [1], [0, 0, 1, 1], [], []>} : vector<8x32xf32>, vector<32x128xf32>, vector<8x128xf32> -> vector<8x128xf32>
    %316 = arith.addf %314, %315 : vector<8x128xf32>
    %317 = arith.negf %316 : vector<8x128xf32>
    %318 = math.exp %317 : vector<8x128xf32>
    %cst_49 = arith.constant 1.000000e+00 : f32
    %319 = vector.broadcast %cst_49 : f32 to vector<8x128xf32>
    %320 = arith.addf %319, %318 : vector<8x128xf32>
    %321 = arith.divf %319, %320 : vector<8x128xf32>
    %322 = math.tanh %316 : vector<8x128xf32>
    %323 = arith.select %3, %321, %322 : vector<8x128xi1>, vector<8x128xf32>
    %324 = vector.extract_strided_slice %323 {offsets = [0, 0], sizes = [8, 32], strides = [1, 1]} : vector<8x128xf32> to vector<8x32xf32>
    %325 = vector.extract_strided_slice %323 {offsets = [0, 32], sizes = [8, 32], strides = [1, 1]} : vector<8x128xf32> to vector<8x32xf32>
    %326 = vector.extract_strided_slice %323 {offsets = [0, 64], sizes = [8, 32], strides = [1, 1]} : vector<8x128xf32> to vector<8x32xf32>
    %327 = vector.extract_strided_slice %323 {offsets = [0, 96], sizes = [8, 32], strides = [1, 1]} : vector<8x128xf32> to vector<8x32xf32>
    %328 = arith.mulf %325, %272 : vector<8x32xf32>
    %329 = arith.mulf %324, %327 : vector<8x32xf32>
    %330 = arith.addf %328, %329 : vector<8x32xf32>
    %331 = math.tanh %330 : vector<8x32xf32>
    %332 = arith.mulf %326, %331 : vector<8x32xf32>
    %333 = vector.shape_cast %282 : vector<8x1xi1> to vector<8x1xi1>
    %334 = vector.broadcast %333 : vector<8x1xi1> to vector<8x32xi1>
    %335 = arith.select %334, %332, %269 : vector<8x32xi1>, vector<8x32xf32>
    %336 = vector.shape_cast %282 : vector<8x1xi1> to vector<8x1xi1>
    %337 = vector.broadcast %336 : vector<8x1xi1> to vector<8x32xi1>
    %338 = arith.select %337, %330, %272 : vector<8x32xi1>, vector<8x32xf32>
    %cst_50 = arith.constant 0.000000e+00 : f32
    %339 = vector.broadcast %cst_50 : f32 to vector<8x32xf32>
    %340 = vector.shape_cast %282 : vector<8x1xi1> to vector<8x1xi1>
    %341 = vector.broadcast %340 : vector<8x1xi1> to vector<8x32xi1>
    %342 = arith.select %341, %332, %339 : vector<8x32xi1>, vector<8x32xf32>
    %343 = math.absf %342 : vector<8x32xf32>
    %344 = arith.cmpf ogt, %343, %280 : vector<8x32xf32>
    %345 = arith.select %344, %342, %279 : vector<8x32xi1>, vector<8x32xf32>
    %346 = arith.select %344, %343, %280 : vector<8x32xi1>, vector<8x32xf32>
    %c5_i32 = arith.constant 5 : i32
    %347 = vector.broadcast %c5_i32 : i32 to vector<8x1xi32>
    %348 = arith.cmpi sgt, %0, %347 : vector<8x1xi32>
    %349 = vector.extract_strided_slice %19 {offsets = [40, 0], sizes = [8, 128], strides = [1, 1]} : vector<64x128xf32> to vector<8x128xf32>
    %cst_51 = arith.constant dense<0.000000e+00> : vector<8x128xf32>
    %350 = tpu.matmul %304, %5, %cst_51 {dimension_numbers = #tpu.dot_dimension_numbers<[1], [0], [0], [1], [0, 0, 1, 1], [], []>} : vector<8x32xf32>, vector<32x128xf32>, vector<8x128xf32> -> vector<8x128xf32>
    %351 = arith.addf %349, %350 : vector<8x128xf32>
    %352 = arith.negf %351 : vector<8x128xf32>
    %353 = math.exp %352 : vector<8x128xf32>
    %cst_52 = arith.constant 1.000000e+00 : f32
    %354 = vector.broadcast %cst_52 : f32 to vector<8x128xf32>
    %355 = arith.addf %354, %353 : vector<8x128xf32>
    %356 = arith.divf %354, %355 : vector<8x128xf32>
    %357 = math.tanh %351 : vector<8x128xf32>
    %358 = arith.select %3, %356, %357 : vector<8x128xi1>, vector<8x128xf32>
    %359 = vector.extract_strided_slice %358 {offsets = [0, 0], sizes = [8, 32], strides = [1, 1]} : vector<8x128xf32> to vector<8x32xf32>
    %360 = vector.extract_strided_slice %358 {offsets = [0, 32], sizes = [8, 32], strides = [1, 1]} : vector<8x128xf32> to vector<8x32xf32>
    %361 = vector.extract_strided_slice %358 {offsets = [0, 64], sizes = [8, 32], strides = [1, 1]} : vector<8x128xf32> to vector<8x32xf32>
    %362 = vector.extract_strided_slice %358 {offsets = [0, 96], sizes = [8, 32], strides = [1, 1]} : vector<8x128xf32> to vector<8x32xf32>
    %363 = arith.mulf %360, %307 : vector<8x32xf32>
    %364 = arith.mulf %359, %362 : vector<8x32xf32>
    %365 = arith.addf %363, %364 : vector<8x32xf32>
    %366 = math.tanh %365 : vector<8x32xf32>
    %367 = arith.mulf %361, %366 : vector<8x32xf32>
    %368 = vector.shape_cast %348 : vector<8x1xi1> to vector<8x1xi1>
    %369 = vector.broadcast %368 : vector<8x1xi1> to vector<8x32xi1>
    %370 = arith.select %369, %367, %304 : vector<8x32xi1>, vector<8x32xf32>
    %371 = vector.shape_cast %348 : vector<8x1xi1> to vector<8x1xi1>
    %372 = vector.broadcast %371 : vector<8x1xi1> to vector<8x32xi1>
    %373 = arith.select %372, %365, %307 : vector<8x32xi1>, vector<8x32xf32>
    %cst_53 = arith.constant 0.000000e+00 : f32
    %374 = vector.broadcast %cst_53 : f32 to vector<8x32xf32>
    %375 = vector.shape_cast %348 : vector<8x1xi1> to vector<8x1xi1>
    %376 = vector.broadcast %375 : vector<8x1xi1> to vector<8x32xi1>
    %377 = arith.select %376, %367, %374 : vector<8x32xi1>, vector<8x32xf32>
    %cst_54 = arith.constant dense<0.000000e+00> : vector<8x128xf32>
    %378 = tpu.matmul %377, %7, %cst_54 {dimension_numbers = #tpu.dot_dimension_numbers<[1], [0], [0], [1], [0, 0, 1, 1], [], []>} : vector<8x32xf32>, vector<32x128xf32>, vector<8x128xf32> -> vector<8x128xf32>
    %379 = vector.broadcast %9 : vector<1x128xf32> to vector<8x128xf32>
    %380 = arith.addf %379, %378 : vector<8x128xf32>
    %cst_55 = arith.constant dense<0.000000e+00> : vector<8x128xf32>
    %381 = tpu.matmul %335, %8, %cst_55 {dimension_numbers = #tpu.dot_dimension_numbers<[1], [0], [0], [1], [0, 0, 1, 1], [], []>} : vector<8x32xf32>, vector<32x128xf32>, vector<8x128xf32> -> vector<8x128xf32>
    %382 = arith.addf %380, %381 : vector<8x128xf32>
    %383 = arith.negf %382 : vector<8x128xf32>
    %384 = math.exp %383 : vector<8x128xf32>
    %cst_56 = arith.constant 1.000000e+00 : f32
    %385 = vector.broadcast %cst_56 : f32 to vector<8x128xf32>
    %386 = arith.addf %385, %384 : vector<8x128xf32>
    %387 = arith.divf %385, %386 : vector<8x128xf32>
    %388 = math.tanh %382 : vector<8x128xf32>
    %389 = arith.select %3, %387, %388 : vector<8x128xi1>, vector<8x128xf32>
    %390 = vector.extract_strided_slice %389 {offsets = [0, 0], sizes = [8, 32], strides = [1, 1]} : vector<8x128xf32> to vector<8x32xf32>
    %391 = vector.extract_strided_slice %389 {offsets = [0, 32], sizes = [8, 32], strides = [1, 1]} : vector<8x128xf32> to vector<8x32xf32>
    %392 = vector.extract_strided_slice %389 {offsets = [0, 64], sizes = [8, 32], strides = [1, 1]} : vector<8x128xf32> to vector<8x32xf32>
    %393 = vector.extract_strided_slice %389 {offsets = [0, 96], sizes = [8, 32], strides = [1, 1]} : vector<8x128xf32> to vector<8x32xf32>
    %394 = arith.mulf %391, %338 : vector<8x32xf32>
    %395 = arith.mulf %390, %393 : vector<8x32xf32>
    %396 = arith.addf %394, %395 : vector<8x32xf32>
    %397 = math.tanh %396 : vector<8x32xf32>
    %398 = arith.mulf %392, %397 : vector<8x32xf32>
    %399 = vector.shape_cast %348 : vector<8x1xi1> to vector<8x1xi1>
    %400 = vector.broadcast %399 : vector<8x1xi1> to vector<8x32xi1>
    %401 = arith.select %400, %398, %335 : vector<8x32xi1>, vector<8x32xf32>
    %402 = vector.shape_cast %348 : vector<8x1xi1> to vector<8x1xi1>
    %403 = vector.broadcast %402 : vector<8x1xi1> to vector<8x32xi1>
    %404 = arith.select %403, %396, %338 : vector<8x32xi1>, vector<8x32xf32>
    %cst_57 = arith.constant 0.000000e+00 : f32
    %405 = vector.broadcast %cst_57 : f32 to vector<8x32xf32>
    %406 = vector.shape_cast %348 : vector<8x1xi1> to vector<8x1xi1>
    %407 = vector.broadcast %406 : vector<8x1xi1> to vector<8x32xi1>
    %408 = arith.select %407, %398, %405 : vector<8x32xi1>, vector<8x32xf32>
    %409 = math.absf %408 : vector<8x32xf32>
    %410 = arith.cmpf ogt, %409, %346 : vector<8x32xf32>
    %411 = arith.select %410, %408, %345 : vector<8x32xi1>, vector<8x32xf32>
    %412 = arith.select %410, %409, %346 : vector<8x32xi1>, vector<8x32xf32>
    %c6_i32 = arith.constant 6 : i32
    %413 = vector.broadcast %c6_i32 : i32 to vector<8x1xi32>
    %414 = arith.cmpi sgt, %0, %413 : vector<8x1xi32>
    %415 = vector.extract_strided_slice %19 {offsets = [48, 0], sizes = [8, 128], strides = [1, 1]} : vector<64x128xf32> to vector<8x128xf32>
    %cst_58 = arith.constant dense<0.000000e+00> : vector<8x128xf32>
    %416 = tpu.matmul %370, %5, %cst_58 {dimension_numbers = #tpu.dot_dimension_numbers<[1], [0], [0], [1], [0, 0, 1, 1], [], []>} : vector<8x32xf32>, vector<32x128xf32>, vector<8x128xf32> -> vector<8x128xf32>
    %417 = arith.addf %415, %416 : vector<8x128xf32>
    %418 = arith.negf %417 : vector<8x128xf32>
    %419 = math.exp %418 : vector<8x128xf32>
    %cst_59 = arith.constant 1.000000e+00 : f32
    %420 = vector.broadcast %cst_59 : f32 to vector<8x128xf32>
    %421 = arith.addf %420, %419 : vector<8x128xf32>
    %422 = arith.divf %420, %421 : vector<8x128xf32>
    %423 = math.tanh %417 : vector<8x128xf32>
    %424 = arith.select %3, %422, %423 : vector<8x128xi1>, vector<8x128xf32>
    %425 = vector.extract_strided_slice %424 {offsets = [0, 0], sizes = [8, 32], strides = [1, 1]} : vector<8x128xf32> to vector<8x32xf32>
    %426 = vector.extract_strided_slice %424 {offsets = [0, 32], sizes = [8, 32], strides = [1, 1]} : vector<8x128xf32> to vector<8x32xf32>
    %427 = vector.extract_strided_slice %424 {offsets = [0, 64], sizes = [8, 32], strides = [1, 1]} : vector<8x128xf32> to vector<8x32xf32>
    %428 = vector.extract_strided_slice %424 {offsets = [0, 96], sizes = [8, 32], strides = [1, 1]} : vector<8x128xf32> to vector<8x32xf32>
    %429 = arith.mulf %426, %373 : vector<8x32xf32>
    %430 = arith.mulf %425, %428 : vector<8x32xf32>
    %431 = arith.addf %429, %430 : vector<8x32xf32>
    %432 = math.tanh %431 : vector<8x32xf32>
    %433 = arith.mulf %427, %432 : vector<8x32xf32>
    %434 = vector.shape_cast %414 : vector<8x1xi1> to vector<8x1xi1>
    %435 = vector.broadcast %434 : vector<8x1xi1> to vector<8x32xi1>
    %436 = arith.select %435, %433, %370 : vector<8x32xi1>, vector<8x32xf32>
    %437 = vector.shape_cast %414 : vector<8x1xi1> to vector<8x1xi1>
    %438 = vector.broadcast %437 : vector<8x1xi1> to vector<8x32xi1>
    %439 = arith.select %438, %431, %373 : vector<8x32xi1>, vector<8x32xf32>
    %cst_60 = arith.constant 0.000000e+00 : f32
    %440 = vector.broadcast %cst_60 : f32 to vector<8x32xf32>
    %441 = vector.shape_cast %414 : vector<8x1xi1> to vector<8x1xi1>
    %442 = vector.broadcast %441 : vector<8x1xi1> to vector<8x32xi1>
    %443 = arith.select %442, %433, %440 : vector<8x32xi1>, vector<8x32xf32>
    %cst_61 = arith.constant dense<0.000000e+00> : vector<8x128xf32>
    %444 = tpu.matmul %443, %7, %cst_61 {dimension_numbers = #tpu.dot_dimension_numbers<[1], [0], [0], [1], [0, 0, 1, 1], [], []>} : vector<8x32xf32>, vector<32x128xf32>, vector<8x128xf32> -> vector<8x128xf32>
    %445 = vector.broadcast %9 : vector<1x128xf32> to vector<8x128xf32>
    %446 = arith.addf %445, %444 : vector<8x128xf32>
    %cst_62 = arith.constant dense<0.000000e+00> : vector<8x128xf32>
    %447 = tpu.matmul %401, %8, %cst_62 {dimension_numbers = #tpu.dot_dimension_numbers<[1], [0], [0], [1], [0, 0, 1, 1], [], []>} : vector<8x32xf32>, vector<32x128xf32>, vector<8x128xf32> -> vector<8x128xf32>
    %448 = arith.addf %446, %447 : vector<8x128xf32>
    %449 = arith.negf %448 : vector<8x128xf32>
    %450 = math.exp %449 : vector<8x128xf32>
    %cst_63 = arith.constant 1.000000e+00 : f32
    %451 = vector.broadcast %cst_63 : f32 to vector<8x128xf32>
    %452 = arith.addf %451, %450 : vector<8x128xf32>
    %453 = arith.divf %451, %452 : vector<8x128xf32>
    %454 = math.tanh %448 : vector<8x128xf32>
    %455 = arith.select %3, %453, %454 : vector<8x128xi1>, vector<8x128xf32>
    %456 = vector.extract_strided_slice %455 {offsets = [0, 0], sizes = [8, 32], strides = [1, 1]} : vector<8x128xf32> to vector<8x32xf32>
    %457 = vector.extract_strided_slice %455 {offsets = [0, 32], sizes = [8, 32], strides = [1, 1]} : vector<8x128xf32> to vector<8x32xf32>
    %458 = vector.extract_strided_slice %455 {offsets = [0, 64], sizes = [8, 32], strides = [1, 1]} : vector<8x128xf32> to vector<8x32xf32>
    %459 = vector.extract_strided_slice %455 {offsets = [0, 96], sizes = [8, 32], strides = [1, 1]} : vector<8x128xf32> to vector<8x32xf32>
    %460 = arith.mulf %457, %404 : vector<8x32xf32>
    %461 = arith.mulf %456, %459 : vector<8x32xf32>
    %462 = arith.addf %460, %461 : vector<8x32xf32>
    %463 = math.tanh %462 : vector<8x32xf32>
    %464 = arith.mulf %458, %463 : vector<8x32xf32>
    %465 = vector.shape_cast %414 : vector<8x1xi1> to vector<8x1xi1>
    %466 = vector.broadcast %465 : vector<8x1xi1> to vector<8x32xi1>
    %467 = arith.select %466, %464, %401 : vector<8x32xi1>, vector<8x32xf32>
    %468 = vector.shape_cast %414 : vector<8x1xi1> to vector<8x1xi1>
    %469 = vector.broadcast %468 : vector<8x1xi1> to vector<8x32xi1>
    %470 = arith.select %469, %462, %404 : vector<8x32xi1>, vector<8x32xf32>
    %cst_64 = arith.constant 0.000000e+00 : f32
    %471 = vector.broadcast %cst_64 : f32 to vector<8x32xf32>
    %472 = vector.shape_cast %414 : vector<8x1xi1> to vector<8x1xi1>
    %473 = vector.broadcast %472 : vector<8x1xi1> to vector<8x32xi1>
    %474 = arith.select %473, %464, %471 : vector<8x32xi1>, vector<8x32xf32>
    %475 = math.absf %474 : vector<8x32xf32>
    %476 = arith.cmpf ogt, %475, %412 : vector<8x32xf32>
    %477 = arith.select %476, %474, %411 : vector<8x32xi1>, vector<8x32xf32>
    %478 = arith.select %476, %475, %412 : vector<8x32xi1>, vector<8x32xf32>
    %c7_i32 = arith.constant 7 : i32
    %479 = vector.broadcast %c7_i32 : i32 to vector<8x1xi32>
    %480 = arith.cmpi sgt, %0, %479 : vector<8x1xi32>
    %481 = vector.extract_strided_slice %19 {offsets = [56, 0], sizes = [8, 128], strides = [1, 1]} : vector<64x128xf32> to vector<8x128xf32>
    %cst_65 = arith.constant dense<0.000000e+00> : vector<8x128xf32>
    %482 = tpu.matmul %436, %5, %cst_65 {dimension_numbers = #tpu.dot_dimension_numbers<[1], [0], [0], [1], [0, 0, 1, 1], [], []>} : vector<8x32xf32>, vector<32x128xf32>, vector<8x128xf32> -> vector<8x128xf32>
    %483 = arith.addf %481, %482 : vector<8x128xf32>
    %484 = arith.negf %483 : vector<8x128xf32>
    %485 = math.exp %484 : vector<8x128xf32>
    %cst_66 = arith.constant 1.000000e+00 : f32
    %486 = vector.broadcast %cst_66 : f32 to vector<8x128xf32>
    %487 = arith.addf %486, %485 : vector<8x128xf32>
    %488 = arith.divf %486, %487 : vector<8x128xf32>
    %489 = math.tanh %483 : vector<8x128xf32>
    %490 = arith.select %3, %488, %489 : vector<8x128xi1>, vector<8x128xf32>
    %491 = vector.extract_strided_slice %490 {offsets = [0, 0], sizes = [8, 32], strides = [1, 1]} : vector<8x128xf32> to vector<8x32xf32>
    %492 = vector.extract_strided_slice %490 {offsets = [0, 32], sizes = [8, 32], strides = [1, 1]} : vector<8x128xf32> to vector<8x32xf32>
    %493 = vector.extract_strided_slice %490 {offsets = [0, 64], sizes = [8, 32], strides = [1, 1]} : vector<8x128xf32> to vector<8x32xf32>
    %494 = vector.extract_strided_slice %490 {offsets = [0, 96], sizes = [8, 32], strides = [1, 1]} : vector<8x128xf32> to vector<8x32xf32>
    %495 = arith.mulf %492, %439 : vector<8x32xf32>
    %496 = arith.mulf %491, %494 : vector<8x32xf32>
    %497 = arith.addf %495, %496 : vector<8x32xf32>
    %498 = math.tanh %497 : vector<8x32xf32>
    %499 = arith.mulf %493, %498 : vector<8x32xf32>
    %500 = vector.shape_cast %480 : vector<8x1xi1> to vector<8x1xi1>
    %501 = vector.broadcast %500 : vector<8x1xi1> to vector<8x32xi1>
    %502 = arith.select %501, %499, %436 : vector<8x32xi1>, vector<8x32xf32>
    %503 = vector.shape_cast %480 : vector<8x1xi1> to vector<8x1xi1>
    %504 = vector.broadcast %503 : vector<8x1xi1> to vector<8x32xi1>
    %505 = arith.select %504, %497, %439 : vector<8x32xi1>, vector<8x32xf32>
    %cst_67 = arith.constant 0.000000e+00 : f32
    %506 = vector.broadcast %cst_67 : f32 to vector<8x32xf32>
    %507 = vector.shape_cast %480 : vector<8x1xi1> to vector<8x1xi1>
    %508 = vector.broadcast %507 : vector<8x1xi1> to vector<8x32xi1>
    %509 = arith.select %508, %499, %506 : vector<8x32xi1>, vector<8x32xf32>
    %cst_68 = arith.constant dense<0.000000e+00> : vector<8x128xf32>
    %510 = tpu.matmul %509, %7, %cst_68 {dimension_numbers = #tpu.dot_dimension_numbers<[1], [0], [0], [1], [0, 0, 1, 1], [], []>} : vector<8x32xf32>, vector<32x128xf32>, vector<8x128xf32> -> vector<8x128xf32>
    %511 = vector.broadcast %9 : vector<1x128xf32> to vector<8x128xf32>
    %512 = arith.addf %511, %510 : vector<8x128xf32>
    %cst_69 = arith.constant dense<0.000000e+00> : vector<8x128xf32>
    %513 = tpu.matmul %467, %8, %cst_69 {dimension_numbers = #tpu.dot_dimension_numbers<[1], [0], [0], [1], [0, 0, 1, 1], [], []>} : vector<8x32xf32>, vector<32x128xf32>, vector<8x128xf32> -> vector<8x128xf32>
    %514 = arith.addf %512, %513 : vector<8x128xf32>
    %515 = arith.negf %514 : vector<8x128xf32>
    %516 = math.exp %515 : vector<8x128xf32>
    %cst_70 = arith.constant 1.000000e+00 : f32
    %517 = vector.broadcast %cst_70 : f32 to vector<8x128xf32>
    %518 = arith.addf %517, %516 : vector<8x128xf32>
    %519 = arith.divf %517, %518 : vector<8x128xf32>
    %520 = math.tanh %514 : vector<8x128xf32>
    %521 = arith.select %3, %519, %520 : vector<8x128xi1>, vector<8x128xf32>
    %522 = vector.extract_strided_slice %521 {offsets = [0, 0], sizes = [8, 32], strides = [1, 1]} : vector<8x128xf32> to vector<8x32xf32>
    %523 = vector.extract_strided_slice %521 {offsets = [0, 32], sizes = [8, 32], strides = [1, 1]} : vector<8x128xf32> to vector<8x32xf32>
    %524 = vector.extract_strided_slice %521 {offsets = [0, 64], sizes = [8, 32], strides = [1, 1]} : vector<8x128xf32> to vector<8x32xf32>
    %525 = vector.extract_strided_slice %521 {offsets = [0, 96], sizes = [8, 32], strides = [1, 1]} : vector<8x128xf32> to vector<8x32xf32>
    %526 = arith.mulf %523, %470 : vector<8x32xf32>
    %527 = arith.mulf %522, %525 : vector<8x32xf32>
    %528 = arith.addf %526, %527 : vector<8x32xf32>
    %529 = math.tanh %528 : vector<8x32xf32>
    %530 = arith.mulf %524, %529 : vector<8x32xf32>
    %531 = vector.shape_cast %480 : vector<8x1xi1> to vector<8x1xi1>
    %532 = vector.broadcast %531 : vector<8x1xi1> to vector<8x32xi1>
    %533 = arith.select %532, %530, %467 : vector<8x32xi1>, vector<8x32xf32>
    %534 = vector.shape_cast %480 : vector<8x1xi1> to vector<8x1xi1>
    %535 = vector.broadcast %534 : vector<8x1xi1> to vector<8x32xi1>
    %536 = arith.select %535, %528, %470 : vector<8x32xi1>, vector<8x32xf32>
    %cst_71 = arith.constant 0.000000e+00 : f32
    %537 = vector.broadcast %cst_71 : f32 to vector<8x32xf32>
    %538 = vector.shape_cast %480 : vector<8x1xi1> to vector<8x1xi1>
    %539 = vector.broadcast %538 : vector<8x1xi1> to vector<8x32xi1>
    %540 = arith.select %539, %530, %537 : vector<8x32xi1>, vector<8x32xf32>
    %541 = math.absf %540 : vector<8x32xf32>
    %542 = arith.cmpf ogt, %541, %478 : vector<8x32xf32>
    %543 = arith.select %542, %540, %477 : vector<8x32xi1>, vector<8x32xf32>
    %cst_72 = arith.constant dense<0.000000e+00> : vector<8x128xf32>
    %544 = tpu.matmul %543, %10, %cst_72 {dimension_numbers = #tpu.dot_dimension_numbers<[1], [0], [0], [1], [0, 0, 1, 1], [], []>} : vector<8x32xf32>, vector<32x128xf32>, vector<8x128xf32> -> vector<8x128xf32>
    %545 = vector.broadcast %11 : vector<1x128xf32> to vector<8x128xf32>
    %546 = arith.addf %544, %545 : vector<8x128xf32>
    %cst_73 = arith.constant dense<0xFF800000> : vector<8xf32>
    %547 = vector.multi_reduction <maximumf>, %546, %cst_73 [1] : vector<8x128xf32> to vector<8xf32>
    %548 = vector.shape_cast %547 : vector<8xf32> to vector<8x1xf32>
    %549 = vector.broadcast %548 : vector<8x1xf32> to vector<8x128xf32>
    %550 = arith.subf %546, %549 : vector<8x128xf32>
    %551 = math.exp %550 : vector<8x128xf32>
    %cst_74 = arith.constant dense<0.000000e+00> : vector<8xf32>
    %552 = vector.multi_reduction <add>, %551, %cst_74 [1] : vector<8x128xf32> to vector<8xf32>
    %553 = vector.shape_cast %552 : vector<8xf32> to vector<8x1xf32>
    %554 = math.log %553 : vector<8x1xf32>
    %555 = vector.broadcast %554 : vector<8x1xf32> to vector<8x128xf32>
    %556 = arith.subf %550, %555 : vector<8x128xf32>
    %c0_75 = arith.constant 0 : index
    %c0_76 = arith.constant 0 : index
    %557 = vector.load %arg3[%c0_75, %c0_76] : memref<8x128xf32, #tpu.memory_space<vmem>>, vector<8x128xf32>
    tpu.vector_store %arg3[%c0_75, %c0_76], %556 {strides = array<i32>} : memref<8x128xf32, #tpu.memory_space<vmem>>, vector<8x128xf32>,
    %558 = tpu.concatenate %502, %533, %505, %536 in 1 : vector<8x32xf32>, vector<8x32xf32>, vector<8x32xf32>, vector<8x32xf32> -> vector<8x128xf32>
    %c0_77 = arith.constant 0 : index
    %c0_78 = arith.constant 0 : index
    %559 = vector.load %arg4[%c0_77, %c0_78] : memref<8x128xf32, #tpu.memory_space<vmem>>, vector<8x128xf32>
    tpu.vector_store %arg4[%c0_77, %c0_78], %558 {strides = array<i32>} : memref<8x128xf32, #tpu.memory_space<vmem>>, vector<8x128xf32>,
    return
  }
}

</mosaic_0001>

<bundles_post_ra>
// kernel: tpu_custom_call.1
= control target key start
LH: loop header
LB: loop body
LE: loop exit
PB: predicated region body
PF: predicated region fallthrough
CT: control target
= control target key end

     0   :  { %10 = vsyncpa [#allocation3], 0  ;;  %s4364_s0 = inlined_call_operand.vmem [shape: f32[64,16], index: 0, kind: input, shape index: {}]   ;;  %s4365_s1 = inlined_call_operand.vmem [shape: s32[8,1], index: 1, kind: input, shape index: {}]   ;;  %s4366_s2 = inlined_call_operand.hbm [shape: f32[168,128], index: 2, kind: input, shape index: {}]   ;;  %s4367_s3 = inlined_call_operand.hbm [shape: f32[8,128], index: 3, kind: output, shape index: {0}]   ;;  %s4368_s4 = inlined_call_operand.hbm [shape: f32[8,128], index: 4, kind: output, shape index: {1}]  }
   0x1   :  { %11 = vsyncpa [#allocation4], 0 }
   0x2   :  { %12 = vsyncpa [#allocation7], 0  ;;  %s3554_s15 = smov [#allocation2]   ;;  %s3482_s19 = scalar_lea.hbm %s4366_s2, 2688 }
   0x3   :  { %s22_s16 = sshll.u32 %s3554_s15, 4  ;;  %p3483_p0 = scmp.ne.s32.totalorder %s4366_s2, %s3482_s19  ;;  %s23_s16 = int_to_ptr.vmem [resolvable:$true] %s22_s16 }
   0x4   :  { %p3486_p1 = scmp.lt.u32.totalorder %s3482_s19, %s4366_s2 }
   0x6   :  { %p3488_p2 = pnand %p3486_p1, %p3483_p0 }
   0x8   :  { %3491 = shalt.err (!%p3488_p2)
}
   0x9   :  { %s3492_s24 = scalar_lea.vmem %s23_s16, 2688  ;;  %p3497_p4 = scmp.lt.s32.totalorder %s23_s16, %s23_s16 }
   0xa   :  { %p3493_p3 = scmp.ne.s32.totalorder %s23_s16, %s3492_s24  ;;  %p3498_p5 = scmp.lt.s32.totalorder %s3492_s24, %s3492_s24 }
   0xc   :  { %p3499_p6 = por %p3498_p5, %p3497_p4 }
   0xe   :  { %p3500_p7 = pnand %p3499_p6, %p3493_p3 }
  0x10   :  { %3503 = shalt.err (!%p3500_p7)
}
  0x11   :  { %s3555_s25 = smov 128   ;;  %s3556_s26 = smov 8  }
  0x12   :  { %28 = dma.hbm_to_vmem [thread:$0]  %s4366_s2, 2688, %s23_s16, [#allocation3], %s3555_s25, %s3555_s25, %s3556_s26  }
  0x13   :  { %3548 = dma.done.wait [#allocation3], 2688  }
  0x14   :  { %3549 = vsyncadd [#allocation3], 4294964608  ;;  %v3557_v0 = vmov 0.0|0.0   ;;  %vm3558_vm0 = vmmov 0   ;;  %v3559_v1 = vmov 0.0   ;;  %vm69_vm1 = vcmask 130048  }
  0x15   :  { %3159 = vmatprep.subr.bf16.mxu1 %v3557_v0  ;;  %2888 = vmatprep.mubr.msk.f32.mxu1 %vm3558_vm0, %v3559_v1  ;;  %v36_v2 = vld [vmem:[#allocation2] sm:$0xff]  ;;  %v37_v3 = vld [vmem:[#allocation2 + $0x8] sm:$0xff]  ;;  %v38_v4 = vld [vmem:[#allocation2 + $0x10] sm:$0xff]  ;;  %v3560_v14 = vmov 0   ;;  %v33_v26 = vlaneseq  ;;  %s3561_s8 = smov 32   ;;  %vm200_vm5 = vcmask 261120  }
  0x16   :  { %v3155_v5 = vpack.c.bf16 %v37_v3, %v36_v2  ;;  %v39_v6 = vld [vmem:[#allocation2 + $0x18] sm:$0xff]  ;;  %v57_v7 = vld [vmem:[%s4364_s0] sm:$0xff]  ;;  %v41_v10 = vld [vmem:[#allocation2 + $0x28] sm:$0xff]  ;;  %3345 = vset.pattern.permute.xlu1 %v3560_v14  ;;  %3346 = vset.pattern.permute.xlu0 %v3560_v14  ;;  %s3564_s23 = smov [#allocation6]  }
  0x17   :  { %v3609_v8 = vpack.c.bf16 %v39_v6, %v38_v4  ;;  %2868 = vmatprep.mubr.msk.f32.mxu0 %vm69_vm1, %v57_v7  ;;  %v40_v9 = vld [vmem:[#allocation2 + $0x20] sm:$0xff]  ;;  %v58_v11 = vld [vmem:[%s4364_s0 + $0x8] sm:$0xff]  ;;  %v3639_v16 = vld [vmem:[#allocation2 + $0x30] ss:$0 sm:$0xff]  ;;  %v3644_v27 = vand.u32 127, %v33_v26  ;;  %s2666_s24 = sshll.u32 %s3564_s23, 4  ;;  %s2667_s24 = int_to_ptr.vmem [resolvable:$true] %s2666_s24 }
  0x18   :  { %3156 = vmatprep.subr.bf16.mxu0 %v3155_v5  ;;  %v3616_v12 = vpack.c.bf16 %v41_v10, %v40_v9  ;;  %v3633_v13 = vld [vmem:[%s4365_s1] sm:$0xff]  ;;  %v59_v36 = vld [vmem:[%s4364_s0 + $0x10] sm:$0xff]  ;;  %v60_v37 = vld [vmem:[%s4364_s0 + $0x18] sm:$0xff]  ;;  %s3504_s25 = scalar_lea.vmem %s2667_s24, 128  ;;  %p3509_p9 = scmp.lt.s32.totalorder %s2667_s24, %s2667_s24 }
  0x19   :  { %3161 = vmatpush3.bf16.msra.mxu1 %v3609_v8  ;;  %3158 = vmatpush3.bf16.msra.mxu0 %v3155_v5  ;;  %vm199_vm2 = vcmp.gt.s32.totalorder %v3633_v13, 0  ;;  %vm35_vm3 = vcmp.lt.s32.totalorder %v3644_v27, 96  ;;  %v61_v38 = vld [vmem:[%s4364_s0 + $0x20] sm:$0xff]  ;;  %v43_v39 = vld [vmem:[#allocation2 + $0x38] sm:$0xff]  ;;  %v45_v42 = vld [vmem:[#allocation2 + $0x48] sm:$0xff]  ;;  %vm486_vm6 = vcmp.gt.s32.totalorder %v3633_v13, 1  ;;  %p3505_p8 = scmp.ne.s32.totalorder %s2667_s24, %s3504_s25  ;;  %p3510_p10 = scmp.lt.s32.totalorder %s3504_s25, %s3504_s25 }
  0x1a   :  { %3162 = vmatprep.subr.bf16.mxu1 %v3557_v0  ;;  %3177 = vmatprep.subr.bf16.mxu0 %v3557_v0  ;;  %v300_v15 = vsel %vm199_vm2, 1, %v3560_v14  ;;  %v44_v40 = vld [vmem:[#allocation2 + $0x40] sm:$0xff]  ;;  %v62_v43 = vld [vmem:[%s4364_s0 + $0x28] sm:$0xff]  ;;  %v46_v44 = vld [vmem:[#allocation2 + $0x50] sm:$0xff]  ;;  %vm775_vm8 = vcmp.gt.s32.totalorder %v3633_v13, 2  ;;  %vm1069_vm10 = vcmp.gt.s32.totalorder %v3633_v13, 3 }
  0x1b   :  { %302 = vperm.xlu1 %3345, %v300_v15   ;;  %v3665_v41 = vpack.c.bf16 %v44_v40, %v43_v39  ;;  %v63_v45 = vld [vmem:[%s4364_s0 + $0x30] sm:$0xff]  ;;  %v3675_v46 = vpack.c.bf16 %v46_v44, %v45_v42  ;;  %v64_v47 = vld [vmem:[%s4364_s0 + $0x38] sm:$0xff]  ;;  %s3562_s0 = smov 64   ;;  %v48_v60 = vld [vmem:[#allocation2 + $0x60] sm:$0xff]  ;;  %vm1363_vm14 = vcmp.gt.s32.totalorder %v3633_v13, 4  ;;  %vm1657_vm2 = vcmp.gt.s32.totalorder %v3633_v13, 5  ;;  %p3511_p11 = por %p3510_p10, %p3509_p9 }
  0x1c   :  { %2869 = vmatmul.mubr.msk.f32.vlgmr.msra.gmra.mrb[0].mxu0 %vm69_vm1, %v58_v11  ;;  %v47_v59 = vld [vmem:[#allocation2 + $0x58] sm:$0xff]  ;;  %v49_v62 = vld [vmem:[#allocation2 + $0x68] sm:$0xff]  ;;  %v50_v63 = vld [vmem:[#allocation2 + $0x70] sm:$0xff] }
  0x1d   :  { %3164 = vmatpush3.bf16.msra.mxu1 %v3616_v12  ;;  %3179 = vmatpush3.bf16.msra.mxu0 %v3609_v8  ;;  %v3710_v61 = vpack.c.bf16 %v48_v60, %v47_v59  ;;  %v3715_v3 = vpack.c.bf16 %v50_v63, %v49_v62  ;;  %v3737_v10 = vld [vmem:[#allocation2 + $0x78] ss:$0 sm:$0xff]  ;;  %p3512_p12 = pnand %p3511_p11, %p3505_p8 }
  0x1e   :  { %3165 = vmatprep.subr.bf16.mxu1 %v3557_v0  ;;  %3180 = vmatprep.subr.bf16.mxu0 %v3557_v0  ;;  %v55_v27 = vld [vmem:[#allocation2 + $0x98] sm:$0xff] }
  0x1f   :  { %2871 = vmatprep.mubr.msk.f32.mxu0 %vm69_vm1, %v59_v36 }
  0x20   :  { %2889 = vmatmul.mubr.f32.vlgmr.msra.gmra.mrb[0].mxu1 %v3559_v1  ;;  %2872 = vmatmul.mubr.msk.f32.gmra.mrb[2].mxu0 %vm69_vm1, %v60_v37 }
  0x21   :  { %3182 = vmatpush3.bf16.msra.mxu0 %v3616_v12  ;;  %2899 = vmatprep.mubr.msk.f32.mxu1 %vm3558_vm0, %v3559_v1 }
  0x22   :  { %3183 = vmatprep.subr.bf16.mxu0 %v3557_v0  ;;  %2874 = vmatprep.mubr.msk.f32.mxu0 %vm69_vm1, %v61_v38 }
  0x23   :  { %3167 = vmatpush3.bf16.msra.mxu1 %v3665_v41 }
  0x24   :  { %3168 = vmatprep.subr.bf16.mxu1 %v3557_v0  ;;  %2875 = vmatmul.mubr.msk.f32.gmra.mrb[4].mxu0 %vm69_vm1, %v62_v43 }
  0x25   :  { %2877 = vmatprep.mubr.msk.f32.mxu0 %vm69_vm1, %v63_v45 }
  0x27   :  { %3170 = vmatpush3.bf16.msra.mxu1 %v3675_v46 }
  0x28   :  { %3171 = vmatprep.subr.bf16.mxu1 %v3557_v0  ;;  %2878 = vmatmul.mubr.msk.f32.gmra.mrb[6].mxu0 %vm69_vm1, %v64_v47 }
  0x29   :  { %2921 = vmatprep.mubr.msk.f32.mxu0 %vm3558_vm0, %v3559_v1 }
  0x9a   :  { %v3689_v49 = vpop.permute.xlu1 %302 }
  0x9b   :  { %vm304_vm4 = vcmp.eq.s32.totalorder %v3689_v49, 1 }
  0xef   :  { %v3641_v17 = vpop.f32.mrb[0].mxu0 }
  0xf0   :  { %v160_v18 = vpop.f32.mrb[1].mxu0  ;;  %v166_v4 = vadd.f32 %v3641_v17, %v3639_v16 }
  0xf1   :  { %v161_v19 = vadd.f32 %v3639_v16, %v160_v18 }
  0xf3   :  { %v270_v20 = vpop.f32.mrb[0].mxu1  ;;  %v3698_v53 = vpop.f32.mrb[2].mxu0 }
  0xf4   :  { %v274_v21 = vadd.f32 %v270_v20, %v161_v19  ;;  %v2890_v22 = vpop.f32.mrb[1].mxu1  ;;  %v3700_v54 = vpop.f32.mrb[3].mxu0 }
  0xf6   :  { %v2688_v23 = vmul.f32 -1.442695, %v274_v21 }
  0xf7   :  { %v3702_v55 = vpop.f32.mrb[4].mxu0 }
  0xf8   :  { %3347 = vpow2.f32 %v2688_v23  ;;  %v3704_v56 = vpop.f32.mrb[5].mxu0 }
  0xf9   :  { %3349 = vtanh.f32 %v274_v21 }
  0xfb   :  { %v3706_v57 = vpop.f32.mrb[6].mxu0 }
  0xfc   :  { %v3708_v58 = vpop.f32.mrb[7].mxu0 }
 0x102   :  { %v3348_v24 = vpop.eup %3347 }
 0x103   :  { %v278_v25 = vadd.f32 1.0, %v3348_v24  ;;  %v3350_v28 = vpop.eup %3349 }
 0x105   :  { %3351 = vrcp.f32 %v278_v25 }
 0x10f   :  { %v3352_v29 = vpop.eup %3351 }
 0x110   :  { %v282_v30 = vsel %vm35_vm3, %v3352_v29, %v3350_v28 }
 0x111   :  { %285 = vrot.lane.b32.xlu0 %v282_v30, %s3561_s8  ;;  %v283_v33 = vmul.f32 0.0, %v282_v30 }
 0x183   :  { %v286_v31 = vpop.permute.xlu0 %285 }
 0x184   :  { %v288_v32 = vmul.f32 %v286_v31, %v282_v30 }
 0x186   :  { %290 = vrot.lane.b32.xlu0 %v288_v32, %s3561_s8  ;;  %v583_v32 = vsel %vm486_vm6, 1, %v3560_v14 }
 0x1f8   :  { %v291_v34 = vpop.permute.xlu0 %290 }
 0x1f9   :  { %v3651_v35 = vadd.f32 %v291_v34, %v283_v33 }
 0x1fb   :  { %3353 = vtanh.f32 %v3651_v35  ;;  %v3753_v36 = vsel %vm304_vm4, %v3651_v35, 0.0 }
 0x205   :  { %v3354_v48 = vpop.eup %3353 }
 0x206   :  { %296 = vrot.lane.b32.xlu1 %v3354_v48, %s3561_s8 }
 0x278   :  { %v297_v50 = vpop.permute.xlu1 %296 }
 0x279   :  { %v299_v51 = vmul.f32 %v297_v50, %v282_v30 }
 0x27b   :  { %v3694_v52 = vsel %vm304_vm4, %v299_v51, 0.0 }
 0x27c   :  { %308 = vrot.lane.b32.xlu0 %v3694_v52, %s3562_s0 }
 0x2ee   :  { %v309_v2 = vpop.permute.xlu0 %308 }
 0x2ef   :  { %2900 = vmatmul.mubr.msk.f32.vlgmr.msra.gmra.mrb[2].mxu1 %vm200_vm5, %v309_v2  ;;  %2922 = vmatmul.mubr.msk.f32.vlgmr.msra.gmra.mrb[8].mxu0 %vm200_vm5, %v309_v2 }
 0x2f0   :  { %3173 = vmatpush3.bf16.msra.mxu1 %v3710_v61  ;;  %2910 = vmatprep.mubr.msk.f32.mxu1 %vm3558_vm0, %v3559_v1 }
 0x2f1   :  { %3174 = vmatprep.subr.bf16.mxu1 %v3557_v0  ;;  %3185 = vmatpush3.bf16.msra.mxu0 %v3665_v41 }
 0x2f2   :  { %3186 = vmatprep.subr.bf16.mxu0 %v3557_v0  ;;  %2932 = vmatprep.mubr.msk.f32.mxu0 %vm3558_vm0, %v3559_v1 }
 0x2f4   :  { %3176 = vmatpush3.bf16.msra.mxu1 %v3715_v3 }
 0x2f5   :  { %3195 = vmatprep.subr.bf16.mxu1 %v3557_v0  ;;  %3188 = vmatpush3.bf16.msra.mxu0 %v3675_v46 }
 0x2f6   :  { %3189 = vmatprep.subr.bf16.mxu0 %v3557_v0 }
 0x2f7   :  { %2911 = vmatmul.mubr.f32.vlgmr.msra.gmra.mrb[2].mxu1 %v3559_v1 }
 0x2f8   :  { %3197 = vmatpush3.bf16.msra.mxu1 %v3609_v8  ;;  %2954 = vmatprep.mubr.msk.f32.mxu1 %vm3558_vm0, %v3559_v1 }
 0x2f9   :  { %3198 = vmatprep.subr.bf16.mxu1 %v3557_v0 }
 0x2fc   :  { %3200 = vmatpush3.bf16.msra.mxu1 %v3616_v12 }
 0x2fd   :  { %3201 = vmatprep.subr.bf16.mxu1 %v3557_v0 }
 0x3c2   :  { %v553_v5 = vpop.f32.mrb[8].mxu0 }
 0x3c3   :  { %v557_v6 = vadd.f32 %v553_v5, %v166_v4  ;;  %v2923_v7 = vpop.f32.mrb[9].mxu0  ;;  %v171_v4 = vadd.f32 %v3639_v16, %v3700_v54 }
 0x3c5   :  { %v2693_v9 = vmul.f32 -1.442695, %v557_v6 }
 0x3c7   :  { %3355 = vpow2.f32 %v2693_v9 }
 0x3ca   :  { %v453_v11 = vpop.f32.mrb[2].mxu1 }
 0x3cb   :  { %v3309_v15 = vadd.f32 %v3737_v10, %v453_v11  ;;  %v2912_v18 = vpop.f32.mrb[3].mxu1 }
 0x3cd   :  { %v2691_v19 = vmul.f32 -1.442695, %v3309_v15 }
 0x3cf   :  { %3357 = vpow2.f32 %v2691_v19 }
 0x3d0   :  { %3359 = vtanh.f32 %v557_v6 }
 0x3d1   :  { %v3356_v20 = vpop.eup %3355 }
 0x3d2   :  { %v561_v21 = vadd.f32 1.0, %v3356_v20 }
 0x3d4   :  { %3361 = vrcp.f32 %v561_v21 }
 0x3d5   :  { %3363 = vtanh.f32 %v3309_v15 }
 0x3d9   :  { %v3358_v22 = vpop.eup %3357 }
 0x3da   :  { %v461_v23 = vadd.f32 1.0, %v3358_v22  ;;  %v3360_v17 = vpop.eup %3359 }
 0x3dc   :  { %3365 = vrcp.f32 %v461_v23 }
 0x3de   :  { %v3362_v24 = vpop.eup %3361 }
 0x3df   :  { %v565_v25 = vsel %vm35_vm3, %v3362_v24, %v3360_v17  ;;  %v3364_v26 = vpop.eup %3363 }
 0x3e0   :  { %568 = vrot.lane.b32.xlu1 %v565_v25, %s3561_s8  ;;  %v566_v37 = vmul.f32 %v565_v25, %v3753_v36 }
 0x3e6   :  { %v3366_v28 = vpop.eup %3365 }
 0x3e7   :  { %v465_v29 = vsel %vm35_vm3, %v3366_v28, %v3364_v26 }
 0x3e8   :  { %468 = vrot.lane.b32.xlu0 %v465_v29, %s3561_s8  ;;  %v466_v40 = vmul.f32 0.0, %v465_v29 }
 0x452   :  { %v569_v30 = vpop.permute.xlu1 %568 }
 0x453   :  { %v571_v31 = vmul.f32 %v569_v30, %v565_v25 }
 0x455   :  { %573 = vrot.lane.b32.xlu1 %v571_v31, %s3561_s8  ;;  %v877_v31 = vsel %vm775_vm8, 1, %v3560_v14 }
 0x459   :  { %585 = vperm.xlu1 %3345, %v583_v32  }
 0x45a   :  { %v469_v33 = vpop.permute.xlu0 %468 }
 0x45b   :  { %v471_v34 = vmul.f32 %v469_v33, %v465_v29 }
 0x45d   :  { %473 = vrot.lane.b32.xlu0 %v471_v34, %s3561_s8 }
 0x4c7   :  { %v574_v38 = vpop.permute.xlu1 %573 }
 0x4c8   :  { %v3756_v39 = vadd.f32 %v574_v38, %v566_v37 }
 0x4ca   :  { %3367 = vtanh.f32 %v3756_v39 }
 0x4cf   :  { %v474_v42 = vpop.permute.xlu0 %473 }
 0x4d0   :  { %v3759_v43 = vadd.f32 %v474_v42, %v466_v40 }
 0x4d2   :  { %3369 = vtanh.f32 %v3759_v43  ;;  %v3830_v42 = vsel %vm304_vm4, %v3759_v43, 0.0 }
 0x4d4   :  { %v3368_v44 = vpop.eup %3367 }
 0x4d5   :  { %579 = vrot.lane.b32.xlu0 %v3368_v44, %s3561_s8 }
 0x4d8   :  { %v3764_v35 = vpop.permute.xlu1 %585 }
 0x4d9   :  { %vm587_vm7 = vcmp.eq.s32.totalorder %v3764_v35, 1 }
 0x4da   :  { %v3821_v34 = vsel %vm587_vm7, %v3756_v39, %v3753_v36 }
 0x4dc   :  { %v3370_v45 = vpop.eup %3369 }
 0x4dd   :  { %479 = vrot.lane.b32.xlu1 %v3370_v45, %s3561_s8 }
 0x547   :  { %v580_v47 = vpop.permute.xlu0 %579 }
 0x548   :  { %v582_v48 = vmul.f32 %v580_v47, %v565_v25 }
 0x54a   :  { %v590_v50 = vsel %vm587_vm7, %v582_v48, 0.0  ;;  %v3772_v51 = vsel %vm587_vm7, %v582_v48, %v3694_v52 }
 0x54b   :  { %592 = vrot.lane.b32.xlu0 %v590_v50, %s3562_s0  ;;  %777 = vrot.lane.b32.xlu1 %v3772_v51, %s3562_s0 }
 0x54f   :  { %v480_v59 = vpop.permute.xlu1 %479 }
 0x550   :  { %v482_v60 = vmul.f32 %v480_v59, %v465_v29 }
 0x552   :  { %v3779_v62 = vsel %vm304_vm4, %v482_v60, 0.0 }
 0x553   :  { %668 = vrot.lane.b32.xlu0 %v3779_v62, %s3562_s0 }
 0x5bd   :  { %v593_v63 = vpop.permute.xlu0 %592  ;;  %v778_v2 = vpop.permute.xlu1 %777 }
 0x5be   :  { %2933 = vmatmul.mubr.msk.f32.vlgmr.msra.gmra.mrb[10].mxu0 %vm200_vm5, %v593_v63  ;;  %2955 = vmatmul.mubr.msk.f32.vlgmr.msra.gmra.mrb[4].mxu1 %vm200_vm5, %v778_v2 }
 0x5bf   :  { %3191 = vmatpush3.bf16.msra.mxu0 %v3710_v61  ;;  %2943 = vmatprep.mubr.msk.f32.mxu0 %vm3558_vm0, %v3559_v1 }
 0x5c0   :  { %3192 = vmatprep.subr.bf16.mxu0 %v3557_v0  ;;  %3203 = vmatpush3.bf16.msra.mxu1 %v3665_v41 }
 0x5c1   :  { %3204 = vmatprep.subr.bf16.mxu1 %v3557_v0  ;;  %2965 = vmatprep.mubr.msk.f32.mxu1 %vm3558_vm0, %v3559_v1 }
 0x5c3   :  { %3194 = vmatpush3.bf16.msra.mxu0 %v3715_v3 }
 0x5c4   :  { %3213 = vmatprep.subr.bf16.mxu0 %v3557_v0  ;;  %3206 = vmatpush3.bf16.msra.mxu1 %v3675_v46 }
 0x5c5   :  { %v669_v52 = vpop.permute.xlu0 %668  ;;  %3207 = vmatprep.subr.bf16.mxu1 %v3557_v0 }
 0x5c6   :  { %2944 = vmatmul.mubr.msk.f32.vlgmr.msra.gmra.mrb[10].mxu0 %vm200_vm5, %v669_v52 }
 0x5c7   :  { %3215 = vmatpush3.bf16.msra.mxu0 %v3609_v8  ;;  %2987 = vmatprep.mubr.msk.f32.mxu0 %vm3558_vm0, %v3559_v1 }
 0x5c8   :  { %3216 = vmatprep.subr.bf16.mxu0 %v3557_v0 }
 0x5cb   :  { %3218 = vmatpush3.bf16.msra.mxu0 %v3616_v12 }
 0x5cc   :  { %3219 = vmatprep.subr.bf16.mxu0 %v3557_v0 }
 0x691   :  { %v847_v5 = vpop.f32.mrb[4].mxu1 }
 0x692   :  { %v851_v6 = vadd.f32 %v847_v5, %v171_v4  ;;  %v2956_v7 = vpop.f32.mrb[5].mxu1  ;;  %v176_v5 = vadd.f32 %v3698_v53, %v3639_v16 }
 0x694   :  { %v2698_v9 = vmul.f32 -1.442695, %v851_v6 }
 0x696   :  { %3371 = vpow2.f32 %v2698_v9 }
 0x699   :  { %v738_v11 = vpop.f32.mrb[10].mxu0 }
 0x69a   :  { %v3310_v15 = vadd.f32 %v3737_v10, %v738_v11  ;;  %v2945_v18 = vpop.f32.mrb[11].mxu0 }
 0x69c   :  { %v2696_v19 = vmul.f32 -1.442695, %v3310_v15 }
 0x69e   :  { %3373 = vpow2.f32 %v2696_v19 }
 0x69f   :  { %3375 = vtanh.f32 %v851_v6 }
 0x6a0   :  { %v3372_v20 = vpop.eup %3371 }
 0x6a1   :  { %v855_v21 = vadd.f32 1.0, %v3372_v20 }
 0x6a3   :  { %3377 = vrcp.f32 %v855_v21 }
 0x6a4   :  { %3379 = vtanh.f32 %v3310_v15 }
 0x6a8   :  { %v3374_v22 = vpop.eup %3373 }
 0x6a9   :  { %v746_v23 = vadd.f32 1.0, %v3374_v22  ;;  %v3376_v54 = vpop.eup %3375 }
 0x6ab   :  { %3381 = vrcp.f32 %v746_v23 }
 0x6ad   :  { %v3378_v17 = vpop.eup %3377 }
 0x6ae   :  { %v859_v24 = vsel %vm35_vm3, %v3378_v17, %v3376_v54  ;;  %v3380_v25 = vpop.eup %3379 }
 0x6af   :  { %862 = vrot.lane.b32.xlu1 %v859_v24, %s3561_s8  ;;  %v860_v37 = vmul.f32 %v859_v24, %v3821_v34 }
 0x6b5   :  { %v3382_v26 = vpop.eup %3381 }
 0x6b6   :  { %v750_v28 = vsel %vm35_vm3, %v3382_v26, %v3380_v25 }
 0x6b7   :  { %753 = vrot.lane.b32.xlu0 %v750_v28, %s3561_s8  ;;  %v751_v44 = vmul.f32 %v750_v28, %v3830_v42 }
 0x721   :  { %v863_v29 = vpop.permute.xlu1 %862 }
 0x722   :  { %v865_v30 = vmul.f32 %v863_v29, %v859_v24 }
 0x724   :  { %867 = vrot.lane.b32.xlu1 %v865_v30, %s3561_s8 }
 0x728   :  { %879 = vperm.xlu1 %3345, %v877_v31   ;;  %v1171_v31 = vsel %vm1069_vm10, 1, %v3560_v14 }
 0x729   :  { %v754_v32 = vpop.permute.xlu0 %753 }
 0x72a   :  { %v756_v33 = vmul.f32 %v754_v32, %v750_v28 }
 0x72c   :  { %758 = vrot.lane.b32.xlu0 %v756_v33, %s3561_s8 }
 0x796   :  { %v868_v38 = vpop.permute.xlu1 %867 }
 0x797   :  { %v3824_v40 = vadd.f32 %v868_v38, %v860_v37 }
 0x799   :  { %3383 = vtanh.f32 %v3824_v40 }
 0x79e   :  { %v759_v45 = vpop.permute.xlu0 %758 }
 0x79f   :  { %v3833_v47 = vadd.f32 %v759_v45, %v751_v44 }
 0x7a1   :  { %3385 = vtanh.f32 %v3833_v47 }
 0x7a3   :  { %v3384_v36 = vpop.eup %3383 }
 0x7a4   :  { %873 = vrot.lane.b32.xlu0 %v3384_v36, %s3561_s8  ;;  %v3909_v36 = vsel %vm587_vm7, %v3833_v47, %v3830_v42 }
 0x7a7   :  { %v3838_v48 = vpop.permute.xlu1 %879 }
 0x7a8   :  { %vm881_vm9 = vcmp.eq.s32.totalorder %v3838_v48, 1 }
 0x7a9   :  { %v3899_v37 = vsel %vm881_vm9, %v3824_v40, %v3821_v34 }
 0x7ab   :  { %v3386_v39 = vpop.eup %3385 }
 0x7ac   :  { %764 = vrot.lane.b32.xlu1 %v3386_v39, %s3561_s8 }
 0x816   :  { %v874_v50 = vpop.permute.xlu0 %873 }
 0x817   :  { %v876_v59 = vmul.f32 %v874_v50, %v859_v24 }
 0x819   :  { %v884_v49 = vsel %vm881_vm9, %v876_v59, 0.0  ;;  %v3846_v43 = vsel %vm881_vm9, %v876_v59, %v3772_v51 }
 0x81a   :  { %886 = vrot.lane.b32.xlu0 %v884_v49, %s3562_s0  ;;  %1071 = vrot.lane.b32.xlu1 %v3846_v43, %s3562_s0 }
 0x81e   :  { %v765_v60 = vpop.permute.xlu1 %764 }
 0x81f   :  { %v3851_v63 = vmul.f32 %v765_v60, %v750_v28 }
 0x821   :  { %v3857_v2 = vsel %vm587_vm7, %v3851_v63, %v3779_v62  ;;  %v770_v42 = vsel %vm587_vm7, %v3851_v63, 0.0 }
 0x822   :  { %962 = vrot.lane.b32.xlu0 %v3857_v2, %s3562_s0 }
 0x88c   :  { %v887_v52 = vpop.permute.xlu0 %886  ;;  %v1072_v51 = vpop.permute.xlu1 %1071 }
 0x88d   :  { %2966 = vmatmul.mubr.msk.f32.vlgmr.msra.gmra.mrb[6].mxu1 %vm200_vm5, %v887_v52  ;;  %2988 = vmatmul.mubr.msk.f32.vlgmr.msra.gmra.mrb[12].mxu0 %vm200_vm5, %v1072_v51 }
 0x88e   :  { %3209 = vmatpush3.bf16.msra.mxu1 %v3710_v61  ;;  %2976 = vmatprep.mubr.msk.f32.mxu1 %vm3558_vm0, %v3559_v1 }
 0x88f   :  { %3210 = vmatprep.subr.bf16.mxu1 %v3557_v0  ;;  %3221 = vmatpush3.bf16.msra.mxu0 %v3665_v41 }
 0x890   :  { %3222 = vmatprep.subr.bf16.mxu0 %v3557_v0  ;;  %2998 = vmatprep.mubr.msk.f32.mxu0 %vm3558_vm0, %v3559_v1 }
 0x892   :  { %3212 = vmatpush3.bf16.msra.mxu1 %v3715_v3 }
 0x893   :  { %3231 = vmatprep.subr.bf16.mxu1 %v3557_v0  ;;  %3224 = vmatpush3.bf16.msra.mxu0 %v3675_v46 }
 0x894   :  { %v963_v4 = vpop.permute.xlu0 %962  ;;  %3225 = vmatprep.subr.bf16.mxu0 %v3557_v0 }
 0x895   :  { %2977 = vmatmul.mubr.msk.f32.vlgmr.msra.gmra.mrb[6].mxu1 %vm200_vm5, %v963_v4  ;;  %v771_v4 = vand.u32 2147483647, %v770_v42 }
 0x896   :  { %3233 = vmatpush3.bf16.msra.mxu1 %v3609_v8  ;;  %3020 = vmatprep.mubr.msk.f32.mxu1 %vm3558_vm0, %v3559_v1 }
 0x897   :  { %3234 = vmatprep.subr.bf16.mxu1 %v3557_v0 }
 0x89a   :  { %3236 = vmatpush3.bf16.msra.mxu1 %v3616_v12 }
 0x89b   :  { %3237 = vmatprep.subr.bf16.mxu1 %v3557_v0 }
 0x960   :  { %v1141_v6 = vpop.f32.mrb[12].mxu0 }
 0x961   :  { %v1145_v7 = vadd.f32 %v1141_v6, %v176_v5  ;;  %v2989_v9 = vpop.f32.mrb[13].mxu0  ;;  %v485_v5 = vand.u32 2147483647, %v3779_v62 }
 0x963   :  { %v2703_v11 = vmul.f32 -1.442695, %v1145_v7  ;;  %vm772_vm12 = vcmp.gt.f32.partialorder %v771_v4, %v485_v5 }
 0x964   :  { %v774_v9 = vsel %vm772_vm12, %v771_v4, %v485_v5 }
 0x965   :  { %3387 = vpow2.f32 %v2703_v11  ;;  %v773_v11 = vsel %vm772_vm12, %v770_v42, %v3779_v62 }
 0x968   :  { %v1032_v15 = vpop.f32.mrb[6].mxu1 }
 0x969   :  { %v3311_v18 = vadd.f32 %v3737_v10, %v1032_v15  ;;  %v2978_v19 = vpop.f32.mrb[7].mxu1 }
 0x96b   :  { %v2701_v20 = vmul.f32 -1.442695, %v3311_v18 }
 0x96d   :  { %3389 = vpow2.f32 %v2701_v20 }
 0x96e   :  { %3391 = vtanh.f32 %v1145_v7 }
 0x96f   :  { %v3388_v21 = vpop.eup %3387 }
 0x970   :  { %v1149_v22 = vadd.f32 1.0, %v3388_v21 }
 0x972   :  { %3393 = vrcp.f32 %v1149_v22 }
 0x973   :  { %3395 = vtanh.f32 %v3311_v18 }
 0x977   :  { %v3390_v23 = vpop.eup %3389 }
 0x978   :  { %v1040_v54 = vadd.f32 1.0, %v3390_v23  ;;  %v3392_v53 = vpop.eup %3391 }
 0x97a   :  { %3397 = vrcp.f32 %v1040_v54 }
 0x97c   :  { %v3394_v17 = vpop.eup %3393 }
 0x97d   :  { %v1153_v24 = vsel %vm35_vm3, %v3394_v17, %v3392_v53  ;;  %v3396_v25 = vpop.eup %3395 }
 0x97e   :  { %1156 = vrot.lane.b32.xlu1 %v1153_v24, %s3561_s8  ;;  %v1154_v38 = vmul.f32 %v1153_v24, %v3899_v37 }
 0x984   :  { %v3398_v26 = vpop.eup %3397 }
 0x985   :  { %v1044_v28 = vsel %vm35_vm3, %v3398_v26, %v3396_v25 }
 0x986   :  { %1047 = vrot.lane.b32.xlu0 %v1044_v28, %s3561_s8  ;;  %v1045_v39 = vmul.f32 %v1044_v28, %v3909_v36 }
 0x9f0   :  { %v1157_v29 = vpop.permute.xlu1 %1156 }
 0x9f1   :  { %v1159_v30 = vmul.f32 %v1157_v29, %v1153_v24 }
 0x9f3   :  { %1161 = vrot.lane.b32.xlu1 %v1159_v30, %s3561_s8 }
 0x9f7   :  { %1173 = vperm.xlu1 %3345, %v1171_v31  }
 0x9f8   :  { %v1048_v32 = vpop.permute.xlu0 %1047 }
 0x9f9   :  { %v1050_v33 = vmul.f32 %v1048_v32, %v1044_v28 }
 0x9fb   :  { %1052 = vrot.lane.b32.xlu0 %v1050_v33, %s3561_s8 }
 0xa65   :  { %v1162_v44 = vpop.permute.xlu1 %1161 }
 0xa66   :  { %v3902_v45 = vadd.f32 %v1162_v44, %v1154_v38 }
 0xa68   :  { %3399 = vtanh.f32 %v3902_v45 }
 0xa6d   :  { %v1053_v50 = vpop.permute.xlu0 %1052 }
 0xa6e   :  { %v3912_v59 = vadd.f32 %v1053_v50, %v1045_v39 }
 0xa70   :  { %3401 = vtanh.f32 %v3912_v59  ;;  %v3996_v5 = vsel %vm881_vm9, %v3912_v59, %v3909_v36 }
 0xa72   :  { %v3400_v34 = vpop.eup %3399 }
 0xa73   :  { %1167 = vrot.lane.b32.xlu0 %v3400_v34, %s3561_s8  ;;  %v1465_v34 = vsel %vm1363_vm14, 1, %v3560_v14 }
 0xa76   :  { %v3917_v49 = vpop.permute.xlu1 %1173 }
 0xa77   :  { %vm1175_vm11 = vcmp.eq.s32.totalorder %v3917_v49, 1 }
 0xa7a   :  { %v3402_v40 = vpop.eup %3401 }
 0xa7b   :  { %1058 = vrot.lane.b32.xlu1 %v3402_v40, %s3561_s8 }
 0xae5   :  { %v1168_v60 = vpop.permute.xlu0 %1167 }
 0xae6   :  { %v1170_v52 = vmul.f32 %v1168_v60, %v1153_v24 }
 0xae8   :  { %v1178_v47 = vsel %vm1175_vm11, %v1170_v52, 0.0  ;;  %v3928_v51 = vsel %vm1175_vm11, %v1170_v52, %v3846_v43  ;;  %v3986_v52 = vsel %vm1175_vm11, %v3902_v45, %v3899_v37 }
 0xae9   :  { %1180 = vrot.lane.b32.xlu0 %v1178_v47, %s3562_s0  ;;  %1365 = vrot.lane.b32.xlu1 %v3928_v51, %s3562_s0 }
 0xaed   :  { %v1059_v6 = vpop.permute.xlu1 %1058 }
 0xaee   :  { %v1061_v7 = vmul.f32 %v1059_v6, %v1044_v28 }
 0xaf0   :  { %v1064_v35 = vsel %vm881_vm9, %v1061_v7, 0.0  ;;  %v3939_v63 = vsel %vm881_vm9, %v1061_v7, %v3857_v2  ;;  %v181_v2 = vadd.f32 %v3639_v16, %v3704_v56 }
 0xaf1   :  { %v1065_v43 = vand.u32 2147483647, %v1064_v35  ;;  %1256 = vrot.lane.b32.xlu0 %v3939_v63, %s3562_s0 }
 0xaf3   :  { %vm1066_vm13 = vcmp.gt.f32.partialorder %v1065_v43, %v774_v9 }
 0xaf4   :  { %v3944_v15 = vsel %vm1066_vm13, %v1064_v35, %v773_v11  ;;  %v3946_v18 = vsel %vm1066_vm13, %v1065_v43, %v774_v9  ;;  %vm2647_vm13 = vcmask 785408  }
 0xb5b   :  { %v1181_v19 = vpop.permute.xlu0 %1180  ;;  %v1366_v20 = vpop.permute.xlu1 %1365 }
 0xb5c   :  { %2999 = vmatmul.mubr.msk.f32.vlgmr.msra.gmra.mrb[14].mxu0 %vm200_vm5, %v1181_v19  ;;  %3021 = vmatmul.mubr.msk.f32.vlgmr.msra.gmra.mrb[8].mxu1 %vm200_vm5, %v1366_v20 }
 0xb5d   :  { %3227 = vmatpush3.bf16.msra.mxu0 %v3710_v61  ;;  %3009 = vmatprep.mubr.msk.f32.mxu0 %vm3558_vm0, %v3559_v1 }
 0xb5e   :  { %3228 = vmatprep.subr.bf16.mxu0 %v3557_v0  ;;  %3239 = vmatpush3.bf16.msra.mxu1 %v3665_v41 }
 0xb5f   :  { %3240 = vmatprep.subr.bf16.mxu1 %v3557_v0  ;;  %3031 = vmatprep.mubr.msk.f32.mxu1 %vm3558_vm0, %v3559_v1 }
 0xb61   :  { %3230 = vmatpush3.bf16.msra.mxu0 %v3715_v3 }
 0xb62   :  { %3249 = vmatprep.subr.bf16.mxu0 %v3557_v0  ;;  %3242 = vmatpush3.bf16.msra.mxu1 %v3675_v46 }
 0xb63   :  { %v1257_v62 = vpop.permute.xlu0 %1256  ;;  %3243 = vmatprep.subr.bf16.mxu1 %v3557_v0 }
 0xb64   :  { %3010 = vmatmul.mubr.msk.f32.vlgmr.msra.gmra.mrb[14].mxu0 %vm200_vm5, %v1257_v62 }
 0xb65   :  { %3251 = vmatpush3.bf16.msra.mxu0 %v3609_v8  ;;  %3053 = vmatprep.mubr.msk.f32.mxu0 %vm3558_vm0, %v3559_v1 }
 0xb66   :  { %3252 = vmatprep.subr.bf16.mxu0 %v3557_v0 }
 0xb69   :  { %3254 = vmatpush3.bf16.msra.mxu0 %v3616_v12 }
 0xb6a   :  { %3255 = vmatprep.subr.bf16.mxu0 %v3557_v0 }
 0xc2f   :  { %v1435_v21 = vpop.f32.mrb[8].mxu1 }
 0xc30   :  { %v1439_v22 = vadd.f32 %v1435_v21, %v181_v2  ;;  %v3022_v23 = vpop.f32.mrb[9].mxu1 }
 0xc32   :  { %v2708_v54 = vmul.f32 -1.442695, %v1439_v22 }
 0xc34   :  { %3403 = vpow2.f32 %v2708_v54  ;;  %v186_v54 = vadd.f32 %v3702_v55, %v3639_v16 }
 0xc37   :  { %v1326_v53 = vpop.f32.mrb[14].mxu0 }
 0xc38   :  { %v3312_v17 = vadd.f32 %v3737_v10, %v1326_v53  ;;  %v3011_v24 = vpop.f32.mrb[15].mxu0 }
 0xc3a   :  { %v2706_v25 = vmul.f32 -1.442695, %v3312_v17 }
 0xc3c   :  { %3405 = vpow2.f32 %v2706_v25 }
 0xc3d   :  { %3407 = vtanh.f32 %v1439_v22 }
 0xc3e   :  { %v3404_v26 = vpop.eup %3403 }
 0xc3f   :  { %v1443_v28 = vadd.f32 1.0, %v3404_v26 }
 0xc41   :  { %3409 = vrcp.f32 %v1443_v28 }
 0xc42   :  { %3411 = vtanh.f32 %v3312_v17 }
 0xc46   :  { %v3406_v29 = vpop.eup %3405 }
 0xc47   :  { %v1334_v30 = vadd.f32 1.0, %v3406_v29  ;;  %v3408_v56 = vpop.eup %3407 }
 0xc49   :  { %3413 = vrcp.f32 %v1334_v30 }
 0xc4b   :  { %v3410_v31 = vpop.eup %3409 }
 0xc4c   :  { %v1447_v32 = vsel %vm35_vm3, %v3410_v31, %v3408_v56  ;;  %v3412_v33 = vpop.eup %3411 }
 0xc4d   :  { %1450 = vrot.lane.b32.xlu1 %v1447_v32, %s3561_s8  ;;  %v1448_v42 = vmul.f32 %v1447_v32, %v3986_v52 }
 0xc53   :  { %v3414_v38 = vpop.eup %3413 }
 0xc54   :  { %v1338_v44 = vsel %vm35_vm3, %v3414_v38, %v3412_v33 }
 0xc55   :  { %1341 = vrot.lane.b32.xlu0 %v1338_v44, %s3561_s8  ;;  %v1339_v6 = vmul.f32 %v1338_v44, %v3996_v5 }
 0xcbf   :  { %v1451_v39 = vpop.permute.xlu1 %1450 }
 0xcc0   :  { %v1453_v50 = vmul.f32 %v1451_v39, %v1447_v32 }
 0xcc2   :  { %1455 = vrot.lane.b32.xlu1 %v1453_v50, %s3561_s8 }
 0xcc6   :  { %1467 = vperm.xlu1 %3345, %v1465_v34  }
 0xcc7   :  { %v1342_v40 = vpop.permute.xlu0 %1341 }
 0xcc8   :  { %v1344_v60 = vmul.f32 %v1342_v40, %v1338_v44 }
 0xcca   :  { %1346 = vrot.lane.b32.xlu0 %v1344_v60, %s3561_s8  ;;  %v1759_v60 = vsel %vm1657_vm2, 1, %v3560_v14 }
 0xd34   :  { %v1456_v47 = vpop.permute.xlu1 %1455 }
 0xd35   :  { %v3989_v4 = vadd.f32 %v1456_v47, %v1448_v42 }
 0xd37   :  { %3415 = vtanh.f32 %v3989_v4 }
 0xd3c   :  { %v1347_v7 = vpop.permute.xlu0 %1346 }
 0xd3d   :  { %v3999_v35 = vadd.f32 %v1347_v7, %v1339_v6 }
 0xd3f   :  { %3417 = vtanh.f32 %v3999_v35  ;;  %v4091_v13 = vsel %vm1175_vm11, %v3999_v35, %v3996_v5 }
 0xd41   :  { %v3416_v37 = vpop.eup %3415 }
 0xd42   :  { %1461 = vrot.lane.b32.xlu0 %v3416_v37, %s3561_s8 }
 0xd45   :  { %v4004_v43 = vpop.permute.xlu1 %1467 }
 0xd46   :  { %vm1469_vm15 = vcmp.eq.s32.totalorder %v4004_v43, 1 }
 0xd47   :  { %v4081_v6 = vsel %vm1469_vm15, %v3989_v4, %v3986_v52 }
 0xd49   :  { %v3418_v45 = vpop.eup %3417 }
 0xd4a   :  { %1352 = vrot.lane.b32.xlu1 %v3418_v45, %s3561_s8 }
 0xdb4   :  { %v1462_v9 = vpop.permute.xlu0 %1461 }
 0xdb5   :  { %v1464_v11 = vmul.f32 %v1462_v9, %v1447_v32 }
 0xdb7   :  { %v1472_v48 = vsel %vm1469_vm15, %v1464_v11, 0.0  ;;  %v4012_v36 = vsel %vm1469_vm15, %v1464_v11, %v3928_v51 }
 0xdb8   :  { %1474 = vrot.lane.b32.xlu0 %v1472_v48, %s3562_s0  ;;  %1659 = vrot.lane.b32.xlu1 %v4012_v36, %s3562_s0 }
 0xdbc   :  { %v1353_v59 = vpop.permute.xlu1 %1352 }
 0xdbd   :  { %v1355_v19 = vmul.f32 %v1353_v59, %v1338_v44 }
 0xdbf   :  { %v4019_v20 = vsel %vm1175_vm11, %v1355_v19, 0.0  ;;  %v4024_v62 = vsel %vm1175_vm11, %v1355_v19, %v3939_v63 }
 0xdc0   :  { %v1359_v2 = vand.u32 2147483647, %v4019_v20  ;;  %1550 = vrot.lane.b32.xlu0 %v4024_v62, %s3562_s0 }
 0xdc2   :  { %vm4030_vm1 = vcmp.gt.f32.partialorder %v1359_v2, %v3946_v18 }
 0xdc3   :  { %v1361_v21 = vsel %vm4030_vm1, %v4019_v20, %v3944_v15  ;;  %v4041_v63 = vsel %vm4030_vm1, %v1359_v2, %v3946_v18  ;;  %v4153_v20 = vld [vmem:[#allocation2 + $0x30] ss:$0 sm:$0xff] }
 0xe2a   :  { %v1475_v22 = vpop.permute.xlu0 %1474  ;;  %v1660_v23 = vpop.permute.xlu1 %1659 }
 0xe2b   :  { %3032 = vmatmul.mubr.msk.f32.vlgmr.msra.gmra.mrb[10].mxu1 %vm200_vm5, %v1475_v22  ;;  %3054 = vmatmul.mubr.msk.f32.vlgmr.msra.gmra.mrb[16].mxu0 %vm200_vm5, %v1660_v23 }
 0xe2c   :  { %3245 = vmatpush3.bf16.msra.mxu1 %v3710_v61  ;;  %3042 = vmatprep.mubr.msk.f32.mxu1 %vm3558_vm0, %v3559_v1 }
 0xe2d   :  { %3246 = vmatprep.subr.bf16.mxu1 %v3557_v0  ;;  %3257 = vmatpush3.bf16.msra.mxu0 %v3665_v41 }
 0xe2e   :  { %3258 = vmatprep.subr.bf16.mxu0 %v3557_v0  ;;  %3064 = vmatprep.mubr.msk.f32.mxu0 %vm3558_vm0, %v3559_v1 }
 0xe30   :  { %3248 = vmatpush3.bf16.msra.mxu1 %v3715_v3 }
 0xe31   :  { %3267 = vmatprep.subr.bf16.mxu1 %v3557_v0  ;;  %3260 = vmatpush3.bf16.msra.mxu0 %v3675_v46 }
 0xe32   :  { %v1551_v18 = vpop.permute.xlu0 %1550  ;;  %3261 = vmatprep.subr.bf16.mxu0 %v3557_v0 }
 0xe33   :  { %3043 = vmatmul.mubr.msk.f32.vlgmr.msra.gmra.mrb[10].mxu1 %vm200_vm5, %v1551_v18 }
 0xe34   :  { %3269 = vmatpush3.bf16.msra.mxu1 %v3609_v8  ;;  %3086 = vmatprep.mubr.msk.f32.mxu1 %vm3558_vm0, %v3559_v1 }
 0xe35   :  { %3270 = vmatprep.subr.bf16.mxu1 %v3557_v0 }
 0xe38   :  { %3272 = vmatpush3.bf16.msra.mxu1 %v3616_v12 }
 0xe39   :  { %3273 = vmatprep.subr.bf16.mxu1 %v3557_v0 }
 0xefe   :  { %v1729_v53 = vpop.f32.mrb[16].mxu0 }
 0xeff   :  { %v1733_v17 = vadd.f32 %v1729_v53, %v186_v54  ;;  %v3055_v24 = vpop.f32.mrb[17].mxu0 }
 0xf01   :  { %v2713_v25 = vmul.f32 -1.442695, %v1733_v17 }
 0xf03   :  { %3419 = vpow2.f32 %v2713_v25 }
 0xf06   :  { %v1620_v26 = vpop.f32.mrb[10].mxu1 }
 0xf07   :  { %v3313_v28 = vadd.f32 %v3737_v10, %v1620_v26  ;;  %v3044_v29 = vpop.f32.mrb[11].mxu1 }
 0xf09   :  { %v2711_v30 = vmul.f32 -1.442695, %v3313_v28 }
 0xf0b   :  { %3421 = vpow2.f32 %v2711_v30 }
 0xf0c   :  { %3423 = vtanh.f32 %v1733_v17 }
 0xf0d   :  { %v3420_v56 = vpop.eup %3419 }
 0xf0e   :  { %v1737_v31 = vadd.f32 1.0, %v3420_v56 }
 0xf10   :  { %3425 = vrcp.f32 %v1737_v31 }
 0xf11   :  { %3427 = vtanh.f32 %v3313_v28 }
 0xf15   :  { %v3422_v32 = vpop.eup %3421 }
 0xf16   :  { %v1628_v33 = vadd.f32 1.0, %v3422_v32  ;;  %v3424_v16 = vpop.eup %3423 }
 0xf18   :  { %3429 = vrcp.f32 %v1628_v33 }
 0xf1a   :  { %v3426_v55 = vpop.eup %3425 }
 0xf1b   :  { %v1741_v38 = vsel %vm35_vm3, %v3426_v55, %v3424_v16  ;;  %v3428_v44 = vpop.eup %3427 }
 0xf1c   :  { %1744 = vrot.lane.b32.xlu1 %v1741_v38, %s3561_s8  ;;  %v1742_v7 = vmul.f32 %v1741_v38, %v4081_v6 }
 0xf22   :  { %v3430_v39 = vpop.eup %3429 }
 0xf23   :  { %v1632_v50 = vsel %vm35_vm3, %v3430_v39, %v3428_v44  ;;  %v4167_v39 = vld [vmem:[%s4365_s1] sm:$0xff]  ;;  %s3563_s1 = smov 96  }
 0xf24   :  { %1635 = vrot.lane.b32.xlu0 %v1632_v50, %s3561_s8  ;;  %v1633_v9 = vmul.f32 %v1632_v50, %v4091_v13  ;;  %vm1951_vm7 = vcmp.gt.s32.totalorder %v4167_v39, 6  ;;  %vm2245_vm10 = vcmp.gt.s32.totalorder %v4167_v39, 7 }
 0xf8e   :  { %v1745_v34 = vpop.permute.xlu1 %1744 }
 0xf8f   :  { %v1747_v40 = vmul.f32 %v1745_v34, %v1741_v38 }
 0xf91   :  { %1749 = vrot.lane.b32.xlu1 %v1747_v40, %s3561_s8 }
 0xf95   :  { %1761 = vperm.xlu1 %3345, %v1759_v60  }
 0xf96   :  { %v1636_v42 = vpop.permute.xlu0 %1635 }
 0xf97   :  { %v1638_v47 = vmul.f32 %v1636_v42, %v1632_v50 }
 0xf99   :  { %1640 = vrot.lane.b32.xlu0 %v1638_v47, %s3561_s8 }
0x1003   :  { %v1750_v37 = vpop.permute.xlu1 %1749 }
0x1004   :  { %v4084_v45 = vadd.f32 %v1750_v37, %v1742_v7 }
0x1006   :  { %3431 = vtanh.f32 %v4084_v45 }
0x100b   :  { %v1641_v11 = vpop.permute.xlu0 %1640 }
0x100c   :  { %v4094_v48 = vadd.f32 %v1641_v11, %v1633_v9 }
0x100e   :  { %3433 = vtanh.f32 %v4094_v48  ;;  %v4187_v37 = vsel %vm1469_vm15, %v4094_v48, %v4091_v13 }
0x1010   :  { %v3432_v52 = vpop.eup %3431 }
0x1011   :  { %1755 = vrot.lane.b32.xlu0 %v3432_v52, %s3561_s8 }
0x1014   :  { %v4099_v59 = vpop.permute.xlu1 %1761 }
0x1015   :  { %vm1763_vm4 = vcmp.eq.s32.totalorder %v4099_v59, 1 }
0x1016   :  { %v4177_v60 = vsel %vm1763_vm4, %v4084_v45, %v4081_v6 }
0x1018   :  { %v3434_v4 = vpop.eup %3433 }
0x1019   :  { %1646 = vrot.lane.b32.xlu1 %v3434_v4, %s3561_s8 }
0x1083   :  { %v1756_v19 = vpop.permute.xlu0 %1755 }
0x1084   :  { %v1758_v2 = vmul.f32 %v1756_v19, %v1741_v38 }
0x1086   :  { %v1766_v49 = vsel %vm1763_vm4, %v1758_v2, 0.0  ;;  %v4107_v5 = vsel %vm1763_vm4, %v1758_v2, %v4012_v36 }
0x1087   :  { %1768 = vrot.lane.b32.xlu0 %v1766_v49, %s3562_s0  ;;  %1953 = vrot.lane.b32.xlu1 %v4107_v5, %s3562_s0 }
0x108b   :  { %v1647_v35 = vpop.permute.xlu1 %1646 }
0x108c   :  { %v1649_v22 = vmul.f32 %v1647_v35, %v1632_v50  ;;  %v2053_v50 = vsel %vm1951_vm7, 1, %v3560_v14 }
0x108e   :  { %v1652_v23 = vsel %vm1469_vm15, %v1649_v22, 0.0  ;;  %v4117_v18 = vsel %vm1469_vm15, %v1649_v22, %v4024_v62  ;;  %v191_v62 = vadd.f32 %v4153_v20, %v3708_v58 }
0x108f   :  { %v1653_v54 = vand.u32 2147483647, %v1652_v23  ;;  %1844 = vrot.lane.b32.xlu0 %v4117_v18, %s3562_s0 }
0x1091   :  { %vm1654_vm6 = vcmp.gt.f32.partialorder %v1653_v54, %v4041_v63 }
0x1092   :  { %v4127_v36 = vsel %vm1654_vm6, %v1652_v23, %v1361_v21  ;;  %v4130_v53 = vsel %vm1654_vm6, %v1653_v54, %v4041_v63 }
0x10f9   :  { %v1769_v17 = vpop.permute.xlu0 %1768  ;;  %v1954_v24 = vpop.permute.xlu1 %1953 }
0x10fa   :  { %3065 = vmatmul.mubr.msk.f32.vlgmr.msra.gmra.mrb[18].mxu0 %vm200_vm5, %v1769_v17  ;;  %3087 = vmatmul.mubr.msk.f32.vlgmr.msra.gmra.mrb[12].mxu1 %vm200_vm5, %v1954_v24 }
0x10fb   :  { %3263 = vmatpush3.bf16.msra.mxu0 %v3710_v61  ;;  %3075 = vmatprep.mubr.msk.f32.mxu0 %vm3558_vm0, %v3559_v1 }
0x10fc   :  { %3264 = vmatprep.subr.bf16.mxu0 %v3557_v0  ;;  %3275 = vmatpush3.bf16.msra.mxu1 %v3665_v41 }
0x10fd   :  { %3276 = vmatprep.subr.bf16.mxu1 %v3557_v0  ;;  %3097 = vmatprep.mubr.msk.f32.mxu1 %vm3558_vm0, %v3559_v1 }
0x10ff   :  { %3266 = vmatpush3.bf16.msra.mxu0 %v3715_v3 }
0x1100   :  { %3285 = vmatprep.subr.bf16.mxu0 %v3557_v0  ;;  %3278 = vmatpush3.bf16.msra.mxu1 %v3675_v46 }
0x1101   :  { %v1845_v15 = vpop.permute.xlu0 %1844  ;;  %3279 = vmatprep.subr.bf16.mxu1 %v3557_v0 }
0x1102   :  { %3076 = vmatmul.mubr.msk.f32.vlgmr.msra.gmra.mrb[18].mxu0 %vm200_vm5, %v1845_v15 }
0x1103   :  { %3287 = vmatpush3.bf16.msra.mxu0 %v3609_v8  ;;  %3119 = vmatprep.mubr.msk.f32.mxu0 %vm3558_vm0, %v3559_v1 }
0x1104   :  { %3288 = vmatprep.subr.bf16.mxu0 %v3557_v0 }
0x1107   :  { %3290 = vmatpush3.bf16.msra.mxu0 %v3616_v12 }
0x1108   :  { %3291 = vmatprep.subr.bf16.mxu0 %v3557_v0 }
0x11cd   :  { %v2023_v51 = vpop.f32.mrb[12].mxu1 }
0x11ce   :  { %v2027_v21 = vadd.f32 %v2023_v51, %v191_v62  ;;  %v3088_v63 = vpop.f32.mrb[13].mxu1 }
0x11d0   :  { %v2718_v25 = vmul.f32 -1.442695, %v2027_v21 }
0x11d2   :  { %3435 = vpow2.f32 %v2718_v25 }
0x11d5   :  { %v1914_v8 = vpop.f32.mrb[18].mxu0 }
0x11d6   :  { %v3314_v26 = vadd.f32 %v3737_v10, %v1914_v8  ;;  %v3077_v28 = vpop.f32.mrb[19].mxu0 }
0x11d8   :  { %v2716_v29 = vmul.f32 -1.442695, %v3314_v26 }
0x11da   :  { %3437 = vpow2.f32 %v2716_v29 }
0x11db   :  { %3439 = vtanh.f32 %v2027_v21 }
0x11dc   :  { %v3436_v30 = vpop.eup %3435 }
0x11dd   :  { %v2031_v12 = vadd.f32 1.0, %v3436_v30 }
0x11df   :  { %3441 = vrcp.f32 %v2031_v12 }
0x11e0   :  { %3443 = vtanh.f32 %v3314_v26 }
0x11e4   :  { %v3438_v56 = vpop.eup %3437 }
0x11e5   :  { %v1922_v31 = vadd.f32 1.0, %v3438_v56  ;;  %v3440_v58 = vpop.eup %3439 }
0x11e7   :  { %3445 = vrcp.f32 %v1922_v31 }
0x11e9   :  { %v3442_v32 = vpop.eup %3441 }
0x11ea   :  { %v2035_v33 = vsel %vm35_vm3, %v3442_v32, %v3440_v58  ;;  %v3444_v16 = vpop.eup %3443 }
0x11eb   :  { %2038 = vrot.lane.b32.xlu1 %v2035_v33, %s3561_s8  ;;  %v2036_v42 = vmul.f32 %v2035_v33, %v4177_v60 }
0x11f1   :  { %v3446_v10 = vpop.eup %3445 }
0x11f2   :  { %v1926_v55 = vsel %vm35_vm3, %v3446_v10, %v3444_v16  ;;  %v2347_v10 = vsel %vm2245_vm10, 1, %v3560_v14 }
0x11f3   :  { %1929 = vrot.lane.b32.xlu0 %v1926_v55, %s3561_s8  ;;  %v1927_v9 = vmul.f32 %v1926_v55, %v4187_v37 }
0x125d   :  { %v2039_v38 = vpop.permute.xlu1 %2038 }
0x125e   :  { %v2041_v44 = vmul.f32 %v2039_v38, %v2035_v33 }
0x1260   :  { %2043 = vrot.lane.b32.xlu1 %v2041_v44, %s3561_s8 }
0x1264   :  { %2055 = vperm.xlu1 %3345, %v2053_v50  }
0x1265   :  { %v1930_v34 = vpop.permute.xlu0 %1929 }
0x1266   :  { %v1932_v40 = vmul.f32 %v1930_v34, %v1926_v55 }
0x1268   :  { %1934 = vrot.lane.b32.xlu0 %v1932_v40, %s3561_s8 }
0x12d2   :  { %v2044_v47 = vpop.permute.xlu1 %2043 }
0x12d3   :  { %v4180_v7 = vadd.f32 %v2044_v47, %v2036_v42 }
0x12d5   :  { %3447 = vtanh.f32 %v4180_v7 }
0x12da   :  { %v1935_v11 = vpop.permute.xlu0 %1934 }
0x12db   :  { %v4190_v52 = vadd.f32 %v1935_v11, %v1927_v9 }
0x12dd   :  { %3449 = vtanh.f32 %v4190_v52  ;;  %v1945_v14 = vsel %vm1763_vm4, %v4190_v52, %v4187_v37 }
0x12df   :  { %v3448_v6 = vpop.eup %3447 }
0x12e0   :  { %2049 = vrot.lane.b32.xlu0 %v3448_v6, %s3561_s8 }
0x12e3   :  { %v4195_v4 = vpop.permute.xlu1 %2055 }
0x12e4   :  { %vm2057_vm8 = vcmp.eq.s32.totalorder %v4195_v4, 1 }
0x12e5   :  { %v4270_v44 = vsel %vm2057_vm8, %v4180_v7, %v4177_v60 }
0x12e7   :  { %v3450_v45 = vpop.eup %3449 }
0x12e8   :  { %1940 = vrot.lane.b32.xlu1 %v3450_v45, %s3561_s8 }
0x1352   :  { %v2050_v19 = vpop.permute.xlu0 %2049 }
0x1353   :  { %v2052_v2 = vmul.f32 %v2050_v19, %v2035_v33 }
0x1355   :  { %v2060_v43 = vsel %vm2057_vm8, %v2052_v2, 0.0  ;;  %v4203_v13 = vsel %vm2057_vm8, %v2052_v2, %v4107_v5 }
0x1356   :  { %2062 = vrot.lane.b32.xlu0 %v2060_v43, %s3562_s0  ;;  %2247 = vrot.lane.b32.xlu1 %v4203_v13, %s3562_s0 }
0x135a   :  { %v1941_v48 = vpop.permute.xlu1 %1940 }
0x135b   :  { %v1943_v49 = vmul.f32 %v1941_v48, %v1926_v55 }
0x135d   :  { %v4210_v35 = vsel %vm1763_vm4, %v1943_v49, 0.0  ;;  %v4215_v22 = vsel %vm1763_vm4, %v1943_v49, %v4117_v18 }
0x135e   :  { %v1947_v23 = vand.u32 2147483647, %v4210_v35  ;;  %2138 = vrot.lane.b32.xlu0 %v4215_v22, %s3562_s0 }
0x1360   :  { %vm4221_vm9 = vcmp.gt.f32.partialorder %v1947_v23, %v4130_v53 }
0x1361   :  { %v1949_v54 = vsel %vm4221_vm9, %v4210_v35, %v4127_v36  ;;  %v4232_v18 = vsel %vm4221_vm9, %v1947_v23, %v4130_v53 }
0x13c8   :  { %v2063_v17 = vpop.permute.xlu0 %2062  ;;  %v2248_v24 = vpop.permute.xlu1 %2247 }
0x13c9   :  { %3098 = vmatmul.mubr.msk.f32.vlgmr.msra.gmra.mrb[14].mxu1 %vm200_vm5, %v2063_v17  ;;  %3120 = vmatmul.mubr.msk.f32.vlgmr.msra.gmra.mrb[20].mxu0 %vm200_vm5, %v2248_v24 }
0x13ca   :  { %3281 = vmatpush3.bf16.msra.mxu1 %v3710_v61  ;;  %3108 = vmatprep.mubr.msk.f32.mxu1 %vm3558_vm0, %v3559_v1 }
0x13cb   :  { %3282 = vmatprep.subr.bf16.mxu1 %v3557_v0  ;;  %3293 = vmatpush3.bf16.msra.mxu0 %v3665_v41  ;;  %v196_v41 = vadd.f32 %v4153_v20, %v3706_v57 }
0x13cc   :  { %3294 = vmatprep.subr.bf16.mxu0 %v3557_v0  ;;  %3130 = vmatprep.mubr.msk.f32.mxu0 %vm3558_vm0, %v3559_v1 }
0x13ce   :  { %3284 = vmatpush3.bf16.msra.mxu1 %v3715_v3 }
0x13cf   :  { %3296 = vmatpush3.bf16.msra.mxu0 %v3675_v46  ;;  %3303 = vmatprep.subr.bf16.mxu1 %v3557_v0  ;;  %v4253_v46 = vld [vmem:[#allocation2 + $0x78] ss:$0 sm:$0xff] }
0x13d0   :  { %v2139_v53 = vpop.permute.xlu0 %2138  ;;  %3297 = vmatprep.subr.bf16.mxu0 %v3557_v0 }
0x13d1   :  { %3109 = vmatmul.mubr.msk.f32.vlgmr.msra.gmra.mrb[14].mxu1 %vm200_vm5, %v2139_v53 }
0x13d2   :  { %3152 = vmatprep.mubr.msk.f32.mxu1 %vm3558_vm0, %v3559_v1 }
0x149c   :  { %v2317_v15 = vpop.f32.mrb[20].mxu0 }
0x149d   :  { %v2321_v62 = vadd.f32 %v2317_v15, %v196_v41  ;;  %v3121_v51 = vpop.f32.mrb[21].mxu0 }
0x149e   :  { %v52_v51 = vld [vmem:[#allocation2 + $0x80] sm:$0xff] }
0x149f   :  { %v2723_v21 = vmul.f32 -1.442695, %v2321_v62 }
0x14a1   :  { %3451 = vpow2.f32 %v2723_v21  ;;  %v53_v21 = vld [vmem:[#allocation2 + $0x88] sm:$0xff] }
0x14a4   :  { %v2208_v63 = vpop.f32.mrb[14].mxu1 }
0x14a5   :  { %v3315_v25 = vadd.f32 %v4253_v46, %v2208_v63  ;;  %v3110_v8 = vpop.f32.mrb[15].mxu1  ;;  %v54_v63 = vld [vmem:[#allocation2 + $0x90] sm:$0xff] }
0x14a6   :  { %v3307_v8 = vpack.c.bf16 %v55_v27, %v54_v63 }
0x14a7   :  { %v2721_v26 = vmul.f32 -1.442695, %v3315_v25 }
0x14a9   :  { %3453 = vpow2.f32 %v2721_v26 }
0x14aa   :  { %3455 = vtanh.f32 %v2321_v62 }
0x14ab   :  { %v3452_v28 = vpop.eup %3451 }
0x14ac   :  { %v2325_v29 = vadd.f32 1.0, %v3452_v28 }
0x14ae   :  { %3457 = vrcp.f32 %v2325_v29 }
0x14af   :  { %3459 = vtanh.f32 %v3315_v25  ;;  %v3304_v25 = vpack.c.bf16 %v53_v21, %v52_v51 }
0x14b1   :  { %3305 = vmatpush3.bf16.msra.mxu1 %v3304_v25 }
0x14b2   :  { %3306 = vmatprep.subr.bf16.mxu1 %v3557_v0 }
0x14b3   :  { %v3454_v30 = vpop.eup %3453 }
0x14b4   :  { %v2216_v12 = vadd.f32 1.0, %v3454_v30  ;;  %v3456_v57 = vpop.eup %3455 }
0x14b5   :  { %3308 = vmatpush3.bf16.msra.mxu1 %v3307_v8 }
0x14b6   :  { %3461 = vrcp.f32 %v2216_v12 }
0x14b8   :  { %v3458_v20 = vpop.eup %3457 }
0x14b9   :  { %v2329_v56 = vsel %vm35_vm3, %v3458_v20, %v3456_v57  ;;  %v3460_v31 = vpop.eup %3459 }
0x14ba   :  { %2332 = vrot.lane.b32.xlu1 %v2329_v56, %s3561_s8  ;;  %v2330_v50 = vmul.f32 %v2329_v56, %v4270_v44 }
0x14c0   :  { %v3462_v58 = vpop.eup %3461 }
0x14c1   :  { %v2220_v32 = vsel %vm35_vm3, %v3462_v58, %v3460_v31 }
0x14c2   :  { %2223 = vrot.lane.b32.xlu0 %v2220_v32, %s3561_s8  ;;  %v2221_v39 = vmul.f32 %v2220_v32, %v1945_v14 }
0x152c   :  { %v2333_v33 = vpop.permute.xlu1 %2332 }
0x152d   :  { %v2335_v16 = vmul.f32 %v2333_v33, %v2329_v56 }
0x152f   :  { %2337 = vrot.lane.b32.xlu1 %v2335_v16, %s3561_s8 }
0x1533   :  { %2349 = vperm.xlu1 %3345, %v2347_v10  }
0x1534   :  { %v2224_v55 = vpop.permute.xlu0 %2223 }
0x1535   :  { %v2226_v38 = vmul.f32 %v2224_v55, %v2220_v32 }
0x1537   :  { %2228 = vrot.lane.b32.xlu0 %v2226_v38, %s3561_s8 }
0x15a1   :  { %v2338_v34 = vpop.permute.xlu1 %2337 }
0x15a2   :  { %v4273_v40 = vadd.f32 %v2338_v34, %v2330_v50 }
0x15a4   :  { %3463 = vtanh.f32 %v4273_v40 }
0x15a9   :  { %v2229_v42 = vpop.permute.xlu0 %2228 }
0x15aa   :  { %v2231_v47 = vadd.f32 %v2229_v42, %v2221_v39 }
0x15ac   :  { %3465 = vtanh.f32 %v2231_v47  ;;  %v2239_v53 = vsel %vm2057_vm8, %v2231_v47, %v1945_v14 }
0x15ae   :  { %v3464_v9 = vpop.eup %3463 }
0x15af   :  { %2343 = vrot.lane.b32.xlu0 %v3464_v9, %s3561_s8 }
0x15b2   :  { %v4282_v7 = vpop.permute.xlu1 %2349 }
0x15b3   :  { %vm2351_vm11 = vcmp.eq.s32.totalorder %v4282_v7, 1 }
0x15b6   :  { %v3466_v60 = vpop.eup %3465 }
0x15b7   :  { %2234 = vrot.lane.b32.xlu1 %v3466_v60, %s3561_s8 }
0x1621   :  { %v2344_v11 = vpop.permute.xlu0 %2343 }
0x1622   :  { %v4284_v6 = vmul.f32 %v2344_v11, %v2329_v56 }
0x1624   :  { %v2354_v59 = vsel %vm2351_vm11, %v4284_v6, 0.0  ;;  %v2352_v58 = vsel %vm2351_vm11, %v4284_v6, %v4203_v13 }
0x1625   :  { %2356 = vrot.lane.b32.xlu0 %v2354_v59, %s3562_s0 }
0x1629   :  { %v2235_v37 = vpop.permute.xlu1 %2234 }
0x162a   :  { %v2237_v52 = vmul.f32 %v2235_v37, %v2220_v32  ;;  %v2353_v32 = vsel %vm2351_vm11, %v4273_v40, %v4270_v44 }
0x162c   :  { %v2240_v45 = vsel %vm2057_vm8, %v2237_v52, 0.0  ;;  %v2238_v19 = vsel %vm2057_vm8, %v2237_v52, %v4215_v22 }
0x162d   :  { %v2241_v2 = vand.u32 2147483647, %v2240_v45  ;;  %2432 = vrot.lane.b32.xlu1 %v2238_v19, %s3562_s0 }
0x162f   :  { %vm2242_vm12 = vcmp.gt.f32.partialorder %v2241_v2, %v4232_v18 }
0x1630   :  { %v2243_v43 = vsel %vm2242_vm12, %v2240_v45, %v1949_v54  ;;  %v2244_v48 = vsel %vm2242_vm12, %v2241_v2, %v4232_v18 }
0x1697   :  { %v2357_v49 = vpop.permute.xlu0 %2356 }
0x1698   :  { %3131 = vmatmul.mubr.msk.f32.vlgmr.msra.gmra.mrb[22].mxu0 %vm200_vm5, %v2357_v49 }
0x1699   :  { %3299 = vmatpush3.bf16.msra.mxu0 %v3710_v61  ;;  %3141 = vmatprep.mubr.msk.f32.mxu0 %vm3558_vm0, %v3559_v1 }
0x169a   :  { %3300 = vmatprep.subr.bf16.mxu0 %v3557_v0  ;;  %v2727_v0 = vld [vmem:[#allocation2 + $0xa0] ss:$0 sm:$0xff] }
0x169d   :  { %3302 = vmatpush3.bf16.msra.mxu0 %v3715_v3 }
0x169f   :  { %v2433_v22 = vpop.permute.xlu1 %2432 }
0x16a0   :  { %3142 = vmatmul.mubr.msk.f32.vlgmr.msra.gmra.mrb[22].mxu0 %vm200_vm5, %v2433_v22 }
0x1773   :  { %v2502_v23 = vpop.f32.mrb[22].mxu0 }
0x1774   :  { %v3316_v36 = vadd.f32 %v4253_v46, %v2502_v23  ;;  %v3143_v35 = vpop.f32.mrb[23].mxu0 }
0x1776   :  { %v2726_v5 = vmul.f32 -1.442695, %v3316_v36 }
0x1778   :  { %3467 = vpow2.f32 %v2726_v5 }
0x1779   :  { %3469 = vtanh.f32 %v3316_v36 }
0x1782   :  { %v3468_v54 = vpop.eup %3467 }
0x1783   :  { %v2510_v18 = vadd.f32 1.0, %v3468_v54  ;;  %v3470_v61 = vpop.eup %3469 }
0x1785   :  { %3471 = vrcp.f32 %v2510_v18 }
0x178f   :  { %v3472_v17 = vpop.eup %3471 }
0x1790   :  { %v2514_v1 = vsel %vm35_vm3, %v3472_v17, %v3470_v61  ;;  %vm2645_vm3 = vcmask 523264  }
0x1791   :  { %2517 = vrot.lane.b32.xlu0 %v2514_v1, %s3561_s8  ;;  %v2515_v41 = vmul.f32 %v2514_v1, %v2239_v53 }
0x1803   :  { %v2518_v3 = vpop.permute.xlu0 %2517 }
0x1804   :  { %v2520_v24 = vmul.f32 %v2518_v3, %v2514_v1 }
0x1806   :  { %2522 = vrot.lane.b32.xlu1 %v2520_v24, %s3561_s8 }
0x1878   :  { %v2523_v15 = vpop.permute.xlu1 %2522 }
0x1879   :  { %v2525_v62 = vadd.f32 %v2523_v15, %v2515_v41 }
0x187b   :  { %3473 = vtanh.f32 %v2525_v62  ;;  %v2533_v38 = vsel %vm2351_vm11, %v2525_v62, %v2239_v53 }
0x1885   :  { %v3474_v46 = vpop.eup %3473 }
0x1886   :  { %2528 = vrot.lane.b32.xlu0 %v3474_v46, %s3561_s8 }
0x18f8   :  { %v2529_v26 = vpop.permute.xlu0 %2528 }
0x18f9   :  { %v2531_v4 = vmul.f32 %v2529_v26, %v2514_v1 }
0x18fb   :  { %v2534_v28 = vsel %vm2351_vm11, %v2531_v4, 0.0  ;;  %v2532_v12 = vsel %vm2351_vm11, %v2531_v4, %v2238_v19 }
0x18fc   :  { %v2535_v29 = vand.u32 2147483647, %v2534_v28 }
0x18fe   :  { %vm2536_vm0 = vcmp.gt.f32.partialorder %v2535_v29, %v2244_v48 }
0x18ff   :  { %v2537_v30 = vsel %vm2536_vm0, %v2534_v28, %v2243_v43 }
0x1900   :  { %2543 = vrot.lane.b32.xlu1 %v2537_v30, %s3562_s0 }
0x1904   :  { %2633 = vrot.lane.b32.xlu1 %v2532_v12, %s3563_s1 }
0x1972   :  { %v2544_v57 = vpop.permute.xlu1 %2543 }
0x1973   :  { %3153 = vmatmul.mubr.msk.f32.vlgmr.msra.gmra.mrb[16].mxu1 %vm200_vm5, %v2544_v57 }
0x1976   :  { %v2634_v50 = vpop.permute.xlu1 %2633 }
0x1a46   :  { %v2613_v20 = vpop.f32.mrb[16].mxu1 }
0x1a47   :  { %v2614_v56 = vadd.f32 %v2727_v0, %v2613_v20  ;;  %v3154_v31 = vpop.f32.mrb[17].mxu1 }
0x1a49   :  { %2617 = vmax.xlane.f32.xlu0 %v2614_v56 }
0x1a5f   :  { %2629 = vrot.lane.b32.xlu0 %v2352_v58, %s3562_s0 }
0x1a63   :  { %2637 = vrot.lane.b32.xlu0 %v2353_v32, %s3561_s8 }
0x1ad6   :  { %v2618_v33 = vpop.xlane.xlu0 %2617 }
0x1ad7   :  { %v2619_v16 = vsub.f32 %v2614_v56, %v2618_v33 }
0x1ad9   :  { %v2620_v10 = vmul.f32 1.442695, %v2619_v16 }
0x1ada   :  { %v2630_v13 = vpop.permute.xlu0 %2629 }
0x1adb   :  { %3475 = vpow2.f32 %v2620_v10  ;;  %v2644_v44 = vsel %vm200_vm5, %v2630_v13, %v2634_v50 }
0x1ade   :  { %v2638_v14 = vpop.permute.xlu0 %2637 }
0x1adf   :  { %v2646_v40 = vsel %vm2645_vm3, %v2644_v44, %v2638_v14 }
0x1ae5   :  { %v3476_v55 = vpop.eup %3475 }
0x1ae6   :  { %2622 = vadd.xlane.f32.xlu1 %v3476_v55 }
0x1af7   :  { %2641 = vrot.lane.b32.xlu1 %v2533_v38, %s3562_s0 }
0x1b73   :  { %v2623_v34 = vpop.xlane.xlu1 %2622 }
0x1b74   :  { %3477 = vlog2.f32 %v2623_v34 }
0x1b77   :  { %v2642_v39 = vpop.permute.xlu1 %2641 }
0x1b78   :  { %v2648_v42 = vsel %vm2647_vm13, %v2646_v40, %v2642_v39 }
0x1b79   :  { %2649 = vst [vmem:[#allocation6] sm:$0xff] %v2648_v42 }
0x1b7a   :  { %3515 = shalt.err (!%p3512_p12)
}
0x1b7b   :  { %s3516_s28 = scalar_lea.hbm %s4368_s4, 128 }
0x1b7c   :  { %p3517_p13 = scmp.ne.s32.totalorder %s4368_s4, %s3516_s28  ;;  %p3520_p0 = scmp.lt.u32.totalorder %s3516_s28, %s4368_s4 }
0x1b7e   :  { %p3522_p1 = pnand %p3520_p0, %p3517_p13 }
0x1b80   :  { %3525 = shalt.err (!%p3522_p1)
}
0x1b81   :  { %2669 = dma.vmem_to_hbm [thread:$0]  %s2667_s24, 128, %s4368_s4, [#allocation7]   ;;  %v3478_v47 = vpop.eup %3477 }
0x1b82   :  { %s3565_s8 = smov [#allocation5]   ;;  %v2625_v9 = vmul.f32 0.6931472, %v3478_v47 }
0x1b83   :  { %s2656_s9 = sshll.u32 %s3565_s8, 4  ;;  %s2657_s9 = int_to_ptr.vmem [resolvable:$true] %s2656_s9 }
0x1b84   :  { %v2626_v60 = vsub.f32 %v2619_v16, %v2625_v9  ;;  %s3526_s10 = scalar_lea.vmem %s2657_s9, 128  ;;  %p3531_p3 = scmp.lt.s32.totalorder %s2657_s9, %s2657_s9 }
0x1b85   :  { %p3527_p2 = scmp.ne.s32.totalorder %s2657_s9, %s3526_s10  ;;  %p3532_p4 = scmp.lt.s32.totalorder %s3526_s10, %s3526_s10 }
0x1b86   :  { %2627 = vst [vmem:[#allocation5] sm:$0xff] %v2626_v60 }
0x1b87   :  { %p3533_p5 = por %p3532_p4, %p3531_p3 }
0x1b89   :  { %p3534_p6 = pnand %p3533_p5, %p3527_p2 }
0x1b8b   :  { %3537 = shalt.err (!%p3534_p6)
}
0x1b8c   :  { %s3538_s13 = scalar_lea.hbm %s4367_s3, 128 }
0x1b8d   :  { %p3539_p7 = scmp.ne.s32.totalorder %s4367_s3, %s3538_s13  ;;  %p3542_p8 = scmp.lt.u32.totalorder %s3538_s13, %s4367_s3 }
0x1b8f   :  { %p3544_p9 = pnand %p3542_p8, %p3539_p7 }
0x1b91   :  { %3547 = shalt.err (!%p3544_p9)
}
0x1b92   :  { %2659 = dma.vmem_to_hbm [thread:$0]  %s2657_s9, 128, %s4367_s3, [#allocation4]  }
0x1b93   :  { %3550 = dma.done.wait [#allocation4], 128  }
0x1b94   :  { %3551 = vsyncadd [#allocation4], 4294967168 }
0x1b95   :  { %3552 = dma.done.wait [#allocation7], 128  }
0x1b96   :  { %3553 = vsyncadd [#allocation7], 4294967168 }
0x1b97   :  { %2676 = vsyncpa [#allocation3], 1 }
0x1b98   :  { %2677 = vsyncpa [#allocation4], 1 }
0x1b99   :  { %2678 = vsyncpa [#allocation7], 1 }

</bundles_post_ra>
